<compile_context>
chip_gen: v5e
topology: v5e:2x2
jax: 0.10.0
libtpu: 0.0.40
codegen_flags: <defaults>
</compile_context>

<pallas_src>
import jax
import jax.numpy as jnp
from jax.experimental import pallas as pl
from jax.experimental.pallas import tpu as pltpu

TB = 128  # batch rows per grid step: multiple of 8 (sublanes) and keeps the
          # [TB, H] f32 intermediate register/VMEM friendly (no spills).


def _mlp_kernel(x_ref, w1_ref, b1_ref, w2_ref, b2_ref, w3_ref, b3_ref, o_ref):
    # ad_layer1 + relu1: bf16 MXU matmul, f32 accumulate; bias/relu on the VPU in f32
    h = jnp.dot(x_ref[...], w1_ref[...], preferred_element_type=jnp.float32)
    h = jnp.maximum(h + b1_ref[...], 0.0)
    # dropout1: identity in eval mode
    # TODO(synk): training-mode dropout would use pltpu.prng_seed/prng_random_bits

    # ad_layer2 + relu2
    h = jnp.dot(h.astype(jnp.bfloat16), w2_ref[...],
                preferred_element_type=jnp.float32)
    h = jnp.maximum(h + b2_ref[...], 0.0)
    # dropout2: identity in eval mode

    # ad_layer3 (out_features == 1): an N=1 MXU matmul would use a single output
    # column, so do broadcast-multiply + lane reduction (VPU + XLU) instead and
    # fold in the bias from an SMEM scalar.
    y = jnp.sum(h * w3_ref[...], axis=-1, keepdims=True) + b3_ref[0]
    o_ref[...] = jax.nn.sigmoid(y)


def domain_classifier_forward(x, w1_t, b1, w2_t, b2, w3_row, b3):
    """x: [B, in_feature] float32 -> [B, 1] float32 sigmoid probabilities."""
    B, in_f = x.shape
    # Pad the batch up to a tile multiple so the grid covers it exactly.
    b_pad = pl.cdiv(B, TB) * TB
    if b_pad != B:
        x = jnp.pad(x, ((0, b_pad - B), (0, 0)))
    x = x.astype(jnp.bfloat16)  # halves x DMA bytes; accumulation stays f32
    grid = (b_pad // TB,)

    def resident(a):
        nd = a.ndim
        # Constant block index -> Pallas keeps the tile resident, no re-DMA per step.
        return pl.BlockSpec(a.shape, lambda i, _nd=nd: (0,) * _nd)

    out = pl.pallas_call(
        _mlp_kernel,
        out_shape=jax.ShapeDtypeStruct((b_pad, 1), jnp.float32),
        grid_spec=pltpu.PrefetchScalarGridSpec(
            num_scalar_prefetch=0,
            grid=grid,
            in_specs=[
                pl.BlockSpec((TB, in_f), lambda i: (i, 0)),   # x: tiled over batch
                resident(w1_t), resident(b1),                 # weights/biases resident
                resident(w2_t), resident(b2),
                resident(w3_row),
                pl.BlockSpec(memory_space=pltpu.MemorySpace.SMEM),  # b3 scalar
            ],
            # TODO(synk): at very large B a lane-dense [1, TB] output slab (+ wrapper
            # reshape) would avoid the masked 1-lane stores of the (TB, 1) block.
            out_specs=pl.BlockSpec((TB, 1), lambda i: (i, 0)),
        ),
        compiler_params=pltpu.CompilerParams(
            dimension_semantics=("parallel",),  # shards batch tiles across TCs on v7x
        ),
    )(x, w1_t, b1, w2_t, b2, w3_row, b3)
    return out[:B]


def _xavier_normal(key, out_f, in_f):
    # matches nn.init.xavier_normal_ for a [out_f, in_f] Linear weight
    std = jnp.sqrt(2.0 / (in_f + out_f))
    return jax.random.normal(key, (out_f, in_f), dtype=jnp.float32) * std


def make_params(key, in_feature, hidden_size):
    k1, k2, k3 = jax.random.split(key, 3)
    w1 = _xavier_normal(k1, hidden_size, in_feature)   # [H, in]
    w2 = _xavier_normal(k2, hidden_size, hidden_size)  # [H, H]
    w3 = _xavier_normal(k3, 1, hidden_size)            # [1, H]
    b1 = jnp.zeros((1, hidden_size), jnp.float32)
    b2 = jnp.zeros((1, hidden_size), jnp.float32)
    b3 = jnp.zeros((1,), jnp.float32)
    # Pre-transpose the first two weights to [in, out] and cast to bf16 for the
    # MXU (f32 accumulation in-kernel); keep the 1-wide head as an f32 [1, H] row.
    return (w1.T.astype(jnp.bfloat16), b1,
            w2.T.astype(jnp.bfloat16), b2,
            w3, b3)


def reference_forward(x, w1_t, b1, w2_t, b2, w3_row, b3):
    # Same numerics path (bf16 matmuls, f32 accumulate) in plain JAX.
    h = jnp.dot(x.astype(jnp.bfloat16), w1_t, preferred_element_type=jnp.float32)
    h = jnp.maximum(h + b1, 0.0)
    h = jnp.dot(h.astype(jnp.bfloat16), w2_t, preferred_element_type=jnp.float32)
    h = jnp.maximum(h + b2, 0.0)
    y = jnp.sum(h * w3_row, axis=-1, keepdims=True) + b3[0]
    return jax.nn.sigmoid(y)


if __name__ == "__main__":
    # Small shapes consistent with the MLP; B deliberately not a tile multiple
    # so both the grid (2 steps) and the padding path are exercised.
    B, IN_FEATURE, HIDDEN = 200, 256, 256

    key = jax.random.PRNGKey(0)
    kx, kp = jax.random.split(key)
    x = jax.random.normal(kx, (B, IN_FEATURE), dtype=jnp.float32)
    params = make_params(kp, IN_FEATURE, HIDDEN)

    y = jax.block_until_ready(domain_classifier_forward(x, *params))
    y_ref = reference_forward(x, *params)

    assert y.shape == (B, 1)
    assert bool(jnp.all(jnp.isfinite(y)))
    assert jnp.allclose(y, y_ref, atol=2e-3, rtol=2e-3)
    print("KERNEL_OK")
</pallas_src>

<mosaic_0001>
module attributes {stable_mosaic.version = 11 : i64} {
  func.func @_mlp_kernel(%arg0: i32, %arg1: memref<128x256xbf16, #tpu.memory_space<vmem>>, %arg2: memref<256x256xbf16, #tpu.memory_space<vmem>>, %arg3: memref<1x256xf32, #tpu.memory_space<vmem>>, %arg4: memref<256x256xbf16, #tpu.memory_space<vmem>>, %arg5: memref<1x256xf32, #tpu.memory_space<vmem>>, %arg6: memref<1x256xf32, #tpu.memory_space<vmem>>, %arg7: memref<1xf32, #tpu.memory_space<smem>>, %arg8: memref<128x1xf32, #tpu.memory_space<vmem>>) attributes {dimension_semantics = [#tpu.dimension_semantics<parallel>], iteration_bounds = array<i64: 2>, scalar_prefetch = 0 : i64, scratch_operands = 0 : i64, tpu.core_type = #tpu.core_type<tc>, window_params = [{transform_indices = @transform_0, window_bounds = array<i64: 128, 256>}, {pipeline_mode = #tpu.pipeline_mode<synchronous>, transform_indices = @transform_1, window_bounds = array<i64: 256, 256>}, {pipeline_mode = #tpu.pipeline_mode<synchronous>, transform_indices = @transform_2, window_bounds = array<i64: 1, 256>}, {pipeline_mode = #tpu.pipeline_mode<synchronous>, transform_indices = @transform_3, window_bounds = array<i64: 256, 256>}, {pipeline_mode = #tpu.pipeline_mode<synchronous>, transform_indices = @transform_4, window_bounds = array<i64: 1, 256>}, {pipeline_mode = #tpu.pipeline_mode<synchronous>, transform_indices = @transform_5, window_bounds = array<i64: 1, 256>}, {transform_indices = @transform_6, window_bounds = array<i64: 1>}, {transform_indices = @transform_7, window_bounds = array<i64: 128, 1>}]} {
    %c0 = arith.constant 0 : index
    %c0_0 = arith.constant 0 : index
    %0 = vector.load %arg1[%c0, %c0_0] : memref<128x256xbf16, #tpu.memory_space<vmem>>, vector<128x256xbf16>
    %c0_1 = arith.constant 0 : index
    %c0_2 = arith.constant 0 : index
    %1 = vector.load %arg2[%c0_1, %c0_2] : memref<256x256xbf16, #tpu.memory_space<vmem>>, vector<256x256xbf16>
    %cst = arith.constant dense<0.000000e+00> : vector<128x256xf32>
    %2 = tpu.matmul %0, %1, %cst {dimension_numbers = #tpu.dot_dimension_numbers<[1], [0], [0], [1], [0, 0, 1, 1], [], []>} : vector<128x256xbf16>, vector<256x256xbf16>, vector<128x256xf32> -> vector<128x256xf32>
    %c0_3 = arith.constant 0 : index
    %c0_4 = arith.constant 0 : index
    %3 = vector.load %arg3[%c0_3, %c0_4] : memref<1x256xf32, #tpu.memory_space<vmem>>, vector<1x256xf32>
    %4 = vector.broadcast %3 : vector<1x256xf32> to vector<128x256xf32>
    %5 = arith.addf %2, %4 : vector<128x256xf32>
    %cst_5 = arith.constant 0.000000e+00 : f32
    %6 = vector.broadcast %cst_5 : f32 to vector<128x256xf32>
    %7 = arith.maximumf %5, %6 : vector<128x256xf32>
    %8 = arith.truncf %7 : vector<128x256xf32> to vector<128x256xbf16>
    %c0_6 = arith.constant 0 : index
    %c0_7 = arith.constant 0 : index
    %9 = vector.load %arg4[%c0_6, %c0_7] : memref<256x256xbf16, #tpu.memory_space<vmem>>, vector<256x256xbf16>
    %cst_8 = arith.constant dense<0.000000e+00> : vector<128x256xf32>
    %10 = tpu.matmul %8, %9, %cst_8 {dimension_numbers = #tpu.dot_dimension_numbers<[1], [0], [0], [1], [0, 0, 1, 1], [], []>} : vector<128x256xbf16>, vector<256x256xbf16>, vector<128x256xf32> -> vector<128x256xf32>
    %c0_9 = arith.constant 0 : index
    %c0_10 = arith.constant 0 : index
    %11 = vector.load %arg5[%c0_9, %c0_10] : memref<1x256xf32, #tpu.memory_space<vmem>>, vector<1x256xf32>
    %12 = vector.broadcast %11 : vector<1x256xf32> to vector<128x256xf32>
    %13 = arith.addf %10, %12 : vector<128x256xf32>
    %cst_11 = arith.constant 0.000000e+00 : f32
    %14 = vector.broadcast %cst_11 : f32 to vector<128x256xf32>
    %15 = arith.maximumf %13, %14 : vector<128x256xf32>
    %c0_12 = arith.constant 0 : index
    %c0_13 = arith.constant 0 : index
    %16 = vector.load %arg6[%c0_12, %c0_13] : memref<1x256xf32, #tpu.memory_space<vmem>>, vector<1x256xf32>
    %17 = vector.broadcast %16 : vector<1x256xf32> to vector<128x256xf32>
    %18 = arith.mulf %15, %17 : vector<128x256xf32>
    %cst_14 = arith.constant dense<0.000000e+00> : vector<128xf32>
    %19 = vector.multi_reduction <add>, %18, %cst_14 [1] : vector<128x256xf32> to vector<128xf32>
    %20 = vector.shape_cast %19 : vector<128xf32> to vector<128x1xf32>
    %c0_15 = arith.constant 0 : index
    %21 = memref.load %arg7[%c0_15] : memref<1xf32, #tpu.memory_space<smem>>
    %22 = vector.broadcast %21 : f32 to vector<128x1xf32>
    %23 = arith.addf %20, %22 : vector<128x1xf32>
    %24 = arith.negf %23 : vector<128x1xf32>
    %25 = math.exp %24 : vector<128x1xf32>
    %cst_16 = arith.constant 1.000000e+00 : f32
    %26 = vector.broadcast %cst_16 : f32 to vector<128x1xf32>
    %27 = arith.addf %26, %25 : vector<128x1xf32>
    %28 = arith.divf %26, %27 : vector<128x1xf32>
    %c0_17 = arith.constant 0 : index
    %c0_18 = arith.constant 0 : index
    %29 = vector.load %arg8[%c0_17, %c0_18] : memref<128x1xf32, #tpu.memory_space<vmem>>, vector<128x1xf32>
    tpu.vector_store %arg8[%c0_17, %c0_18], %28 {strides = array<i32>} : memref<128x1xf32, #tpu.memory_space<vmem>>, vector<128x1xf32>,
    return
  }
  func.func @transform_0(%arg0: i32) -> (i32, i32) {
    %c0_i32 = arith.constant 0 : i32
    %c0_i32_0 = arith.constant 0 : i32
    return %arg0, %c0_i32 : i32, i32
  }
  func.func @transform_1(%arg0: i32) -> (i32, i32) {
    %c0_i32 = arith.constant 0 : i32
    %c0_i32_0 = arith.constant 0 : i32
    %c0_i32_1 = arith.constant 0 : i32
    return %c0_i32, %c0_i32_0 : i32, i32
  }
  func.func @transform_2(%arg0: i32) -> (i32, i32) {
    %c0_i32 = arith.constant 0 : i32
    %c0_i32_0 = arith.constant 0 : i32
    %c0_i32_1 = arith.constant 0 : i32
    return %c0_i32, %c0_i32_0 : i32, i32
  }
  func.func @transform_3(%arg0: i32) -> (i32, i32) {
    %c0_i32 = arith.constant 0 : i32
    %c0_i32_0 = arith.constant 0 : i32
    %c0_i32_1 = arith.constant 0 : i32
    return %c0_i32, %c0_i32_0 : i32, i32
  }
  func.func @transform_4(%arg0: i32) -> (i32, i32) {
    %c0_i32 = arith.constant 0 : i32
    %c0_i32_0 = arith.constant 0 : i32
    %c0_i32_1 = arith.constant 0 : i32
    return %c0_i32, %c0_i32_0 : i32, i32
  }
  func.func @transform_5(%arg0: i32) -> (i32, i32) {
    %c0_i32 = arith.constant 0 : i32
    %c0_i32_0 = arith.constant 0 : i32
    %c0_i32_1 = arith.constant 0 : i32
    return %c0_i32, %c0_i32_0 : i32, i32
  }
  func.func @transform_6(%arg0: i32) -> i32 {
    %c0_i32 = arith.constant 0 : i32
    %c0_i32_0 = arith.constant 0 : i32
    return %c0_i32 : i32
  }
  func.func @transform_7(%arg0: i32) -> (i32, i32) {
    %c0_i32 = arith.constant 0 : i32
    %c0_i32_0 = arith.constant 0 : i32
    return %arg0, %c0_i32 : i32, i32
  }
}

</mosaic_0001>

<bundles_post_ra>
// kernel: tpu_custom_call.1
= control target key start
LH: loop header
LB: loop body
LE: loop exit
PB: predicated region body
PF: predicated region fallthrough
CT: control target
= control target key end

     0   :  { %s2873_s0 = inlined_call_operand.hbm [shape: bf16[256,256], index: 0, kind: input, shape index: {}]   ;;  %s2874_s1 = inlined_call_operand.hbm [shape: bf16[256,256], index: 1, kind: input, shape index: {}]   ;;  %s2875_s2 = inlined_call_operand.vmem [shape: f32[1,256], index: 2, kind: input, shape index: {}]   ;;  %s2876_s3 = inlined_call_operand.hbm [shape: bf16[256,256], index: 3, kind: input, shape index: {}]   ;;  %s2877_s4 = inlined_call_operand.vmem [shape: f32[1,256], index: 4, kind: input, shape index: {}]   ;;  %s2878_s5 = inlined_call_operand.vmem [shape: f32[1,256], index: 5, kind: input, shape index: {}]   ;;  %s2879_s6 = inlined_call_operand.<no memory space> [shape: f32[1], index: 6, kind: input, shape index: {}]   ;;  %s2880_s7 = inlined_call_operand.vmem [shape: f32[256,1], index: 7, kind: output, shape index: {}]  }
   0x1   :  { %12 = sst [smem:[#allocation2]] %s2879_s6 }
   0x2   :  { %13 = vsyncpa [#allocation4], 0 }
   0x3   :  { %15 = vsyncpa [#allocation4 + $0x1], 0 }
   0x4   :  { %16 = vsyncpa [#allocation6], 0  ;;  %s2552_s26 = smov 0   ;;  %s2554_s27 = smov 0  }
   0x5   :  { %s2556_s28 = smov 0   ;;  %s2558_s29 = smov 0  }
   0x6 LB: > { %s1813_s6 = sadd.s32 4294967295, %s2503_s29   ;;  %p42_p0 = scmp.ne.s32.totalorder %s2495_s27, %s2491_s26  ;;  %s2503_s29 = sphi %s2558_s29, %s2889_s29   ;;  %s2499_s28 = sphi %s2556_s28, %s2888_s28   ;;  %s2495_s27 = sphi %s2554_s27, %s2887_s27   ;;  %s2491_s26 = sphi %s2552_s26, %s2886_s26  }
   0x7   : > { %p2574_p1 = scmp.eq.s32.totalorder %s1813_s6, 0  ;;  %p1815_p2 = scmp.ge.s32.totalorder %s2503_s29, 1 }
   0x8   : > { %p205_p3 = scmp.lt.s32.totalorder %s2503_s29, 3  ;;  %s216_s11 = sshll.u32 %s2874_s1, 4  ;;  %s217_s11 = int_to_ptr.hbm [resolvable:$true] %s216_s11 }
   0x9   : > { %p2582_p4 = por %p2574_p1, %p42_p0  ;;  %s2505_s13 = smov [#allocation5]  }
   0xa   : > { %p2589_p5 = pnand %p1815_p2, %p205_p3  ;;  %s218_s14 = sshll.u32 %s2505_s13, 4  ;;  %s219_s14 = int_to_ptr.vmem [resolvable:$true] %s218_s14 }
   0xb   : > { %s233_s17 = sshll.u32 %s2876_s3, 4  ;;  %s2506_s18 = smov 128   ;;  %s234_s17 = int_to_ptr.hbm [resolvable:$true] %s233_s17 }
   0xc   : > { %p2259_p6 = pneg %p2589_p5  ;;  %s2507_s19 = smov 8  }
   0xd   : > { %s2508_s20 = smov [#allocation7]   ;;  %s2607_s22 = sadd.s32 1, %s2503_s29  }
   0xe   : > { %p2260_p7 = pnand %p2259_p6, %p2574_p1  ;;  %s235_s21 = sshll.u32 %s2508_s20, 4  ;;  %s236_s21 = int_to_ptr.vmem [resolvable:$true] %s235_s21 }
   0xf   : > { %s29_s23 = sadd.s32 1, %s2499_s28  ;;  %s26_s24 = ssub.s32 %s2503_s29, %s2607_s22 }
  0x10   : > { %2262 = dma.hbm_to_vmem [thread:$0]  (!%p2260_p7), %s217_s11, 4096, %s219_s14, [#allocation6], %s2506_s18, %s2506_s18, %s2507_s19  }
  0x11   : > { %2265 = dma.hbm_to_vmem [thread:$0]  (!%p2260_p7), %s234_s17, 4096, %s236_s21, [#allocation6], %s2506_s18, %s2506_s18, %s2507_s19  }
  0x12   : > { %p36_p8 = scmp.ne.s32.totalorder %s2499_s28, %s2495_s27  ;;  %p27_p9 = scmp.eq.s32.totalorder %s26_s24, 0 }
  0x13   : > { %p37_p10 = scmp.eq.s32.totalorder %s2503_s29, 0  ;;  %s258_s25 = sand.u32 1, %s2499_s28  }
  0x14   : > { %s2617_s26 = scalar_select %p27_p9, %s2499_s28, %s29_s23  }
  0x15   : > { %p38_p11 = por %p37_p10, %p36_p8  ;;  %p2272_p12 = scmp.lt.s32.totalorder %s2503_s29, 2 }
  0x16   : > { %s1819_s9 = sshll.u32 %s258_s25, 7  ;;  %s2168_s10 = sshll.u32 %s2503_s29, 7 }
  0x17   : > { %s268_s14 = scalar_lea.hbm %s2873_s0, %s2168_s10  ;;  %s262_s16 = scalar_lea.vmem [#allocation3], %s1819_s9 }
  0x18   : > { %s269_s15 = sshll.u32 %s268_s14, 4  ;;  %s271_s17 = sshll.u32 %s262_s16, 4  ;;  %s270_s15 = int_to_ptr.hbm [resolvable:$true] %s269_s15  ;;  %s272_s17 = int_to_ptr.vmem [resolvable:$true] %s271_s17 }
  0x19   : > { %p2624_p13 = pnand %p2272_p12, %p38_p11  ;;  %s259_s21 = scalar_lea.sflag [#allocation4], %s258_s25 }
  0x1a   : > { %s2435_s23 = sshra.s32 %s270_s15, 4  ;;  %s2442_s9 = scalar_lea.hbm %s2873_s0, 256  ;;  %s2436_s23 = int_to_ptr.hbm [resolvable:$true] %s2435_s23 }
  0x1b   : > { %s2437_s24 = scalar_lea.hbm %s2436_s23, 128  ;;  %p2439_p2 = pneg %p2624_p13 }
  0x1c   : > { %p2438_p0 = scmp.ne.s32.totalorder %s2436_s23, %s2437_s24  ;;  %p2443_p7 = scmp.lt.s32.totalorder %s2436_s23, %s2873_s0 }
  0x1d   : > { %p2444_p8 = scmp.lt.s32.totalorder %s2442_s9, %s2437_s24 }
  0x1e   : > { %p2440_p3 = pnand %p2439_p2, %p2438_p0 }
  0x1f   : > { %p2445_p9 = por %p2444_p8, %p2443_p7 }
  0x20   : > { %p2441_p6 = pneg %p2440_p3 }
  0x22   : > { %p2446_p10 = pnand %p2445_p9, %p2441_p6 }
  0x24   : > { %2449 = shalt.err (!%p2446_p10)
}
  0x25   : > { %2269 = dma.hbm_to_vmem [thread:$0]  (!%p2624_p13), %s270_s15, 2048, %s272_s17, %s259_s21, %s2506_s18, %s2506_s18, %s2507_s19  }
  0x26   : > { %283 = sbr.rel (%p2589_p5) target bundleno = 637 (0x27d), region = 48  ;;  %s285_s25 = sand.u32 (!%p2589_p5), 1, %s2495_s27  }
  0x27   : > { %s1824_s16 = sshll.u32 (!%p2589_p5), %s285_s25, 7  ;;  %s286_s10 = scalar_lea.sflag (!%p2589_p5), [#allocation4], %s285_s25 }
  0x28   : > { %s2644_s11 = scalar_lea.vmem (!%p2589_p5), [#allocation3], %s1824_s16 }
  0x2b   : > { %2482 = dma.done.wait (%p2582_p4), %s286_s10, 2048  }
  0x2c   : > { %2484 = vsyncadd (%p2582_p4), %s286_s10, 4294965248 }
  0x2d   : > { %2486 = dma.done.wait (%p2574_p1), [#allocation6], 8192  }
  0x2e   : > { %2488 = vsyncadd (%p2574_p1), [#allocation6], 4294959104  ;;  %v1951_v0 = vld [vmem:[#allocation5 + $0x70] sm:$0xf]  ;;  %v2200_v1 = vld [vmem:[#allocation5 + $0x74] sm:$0xf0] }
  0x2f   : > { %v2015_v2 = vld [vmem:[#allocation5 + $0xf0] sm:$0xf]  ;;  %v1952_v3 = vor.u32 %v2200_v1, %v1951_v0  ;;  %v2216_v4 = vld [vmem:[#allocation5 + $0xf4] sm:$0xf0]  ;;  %v2199_v5 = vld [vmem:[#allocation5 + $0x74] sm:$0xf] }
  0x30   : > { %v1953_v6 = vld [vmem:[#allocation5 + $0x78] sm:$0xf0]  ;;  %v2016_v7 = vor.u32 %v2216_v4, %v2015_v2  ;;  %v2215_v9 = vld [vmem:[#allocation5 + $0xf4] sm:$0xf]  ;;  %v1943_v11 = vld [vmem:[#allocation5 + $0x60] sm:$0xf] }
  0x31   : > { %v1956_v8 = vor.u32 %v2199_v5, %v1953_v6  ;;  %v2017_v10 = vld [vmem:[#allocation5 + $0xf8] sm:$0xf0]  ;;  %632 = vmatpush.bf16.msra.mxu0 %v1952_v3  ;;  %v2198_v13 = vld [vmem:[#allocation5 + $0x64] sm:$0xf0]  ;;  %v2007_v14 = vld [vmem:[#allocation5 + $0xe0] sm:$0xf] }
  0x32   : > { %v2020_v12 = vor.u32 %v2215_v9, %v2017_v10  ;;  %v2214_v15 = vld [vmem:[#allocation5 + $0xe4] sm:$0xf0]  ;;  %681 = vmatpush.bf16.msra.mxu1 %v2016_v7  ;;  %v1944_v16 = vor.u32 %v2198_v13, %v1943_v11  ;;  %v2197_v18 = vld [vmem:[#allocation5 + $0x64] sm:$0xf]  ;;  %v1945_v19 = vld [vmem:[#allocation5 + $0x68] sm:$0xf0] }
  0x33   : > { %730 = vmatpush.bf16.msra.mxu2 %v1956_v8  ;;  %v2008_v17 = vor.u32 %v2214_v15, %v2007_v14  ;;  %v2213_v20 = vld [vmem:[#allocation5 + $0xe4] sm:$0xf]  ;;  %v1948_v21 = vor.u32 %v2197_v18, %v1945_v19  ;;  %v2009_v22 = vld [vmem:[#allocation5 + $0xe8] sm:$0xf0]  ;;  %v1935_v23 = vld [vmem:[#allocation5 + $0x50] sm:$0xf] }
  0x34   : > { %779 = vmatpush.bf16.msra.mxu3 %v2020_v12  ;;  %v2196_v24 = vld [vmem:[#allocation5 + $0x54] sm:$0xf0]  ;;  %v2012_v25 = vor.u32 %v2213_v20, %v2009_v22  ;;  %v1999_v26 = vld [vmem:[#allocation5 + $0xd0] sm:$0xf]  ;;  %v2195_v28 = vld [vmem:[#allocation5 + $0x54] sm:$0xf] }
  0x35   : > { %v2212_v27 = vld [vmem:[#allocation5 + $0xd4] sm:$0xf0]  ;;  %633 = vmatpush.bf16.msra.mxu0 %v1944_v16  ;;  %v1936_v29 = vor.u32 %v2196_v24, %v1935_v23  ;;  %v1937_v30 = vld [vmem:[#allocation5 + $0x58] sm:$0xf0]  ;;  %v2211_v31 = vld [vmem:[#allocation5 + $0xd4] sm:$0xf] }
  0x36   : > { %v2001_v32 = vld [vmem:[#allocation5 + $0xd8] sm:$0xf0]  ;;  %682 = vmatpush.bf16.msra.mxu1 %v2008_v17  ;;  %v2000_v33 = vor.u32 %v2212_v27, %v1999_v26  ;;  %v1940_v34 = vor.u32 %v2195_v28, %v1937_v30  ;;  %v1927_v35 = vld [vmem:[#allocation5 + $0x40] sm:$0xf]  ;;  %v2194_v36 = vld [vmem:[#allocation5 + $0x44] sm:$0xf0] }
  0x37   : > { %731 = vmatpush.bf16.msra.mxu2 %v1948_v21  ;;  %v1991_v37 = vld [vmem:[#allocation5 + $0xc0] sm:$0xf]  ;;  %v2004_v38 = vor.u32 %v2211_v31, %v2001_v32  ;;  %v2210_v39 = vld [vmem:[#allocation5 + $0xc4] sm:$0xf0]  ;;  %v2193_v40 = vld [vmem:[#allocation5 + $0x44] sm:$0xf]  ;;  %v1928_v44 = vor.u32 %v2194_v36, %v1927_v35 }
  0x38   : > { %780 = vmatpush.bf16.msra.mxu3 %v2012_v25  ;;  %v1929_v41 = vld [vmem:[#allocation5 + $0x48] sm:$0xf0]  ;;  %v2209_v42 = vld [vmem:[#allocation5 + $0xc4] sm:$0xf]  ;;  %v1992_v45 = vor.u32 %v2210_v39, %v1991_v37  ;;  %v1919_v47 = vld [vmem:[#allocation5 + $0x30] sm:$0xf] }
  0x39   : > { %v1993_v43 = vld [vmem:[#allocation5 + $0xc8] sm:$0xf0]  ;;  %634 = vmatpush.bf16.msra.mxu0 %v1936_v29  ;;  %v1932_v46 = vor.u32 %v2193_v40, %v1929_v41  ;;  %v2192_v48 = vld [vmem:[#allocation5 + $0x34] sm:$0xf0]  ;;  %v1983_v49 = vld [vmem:[#allocation5 + $0xb0] sm:$0xf] }
  0x3a   : > { %683 = vmatpush.bf16.msra.mxu1 %v2000_v33  ;;  %v1996_v50 = vor.u32 %v2209_v42, %v1993_v43  ;;  %v2208_v51 = vld [vmem:[#allocation5 + $0xb4] sm:$0xf0]  ;;  %v2191_v52 = vld [vmem:[#allocation5 + $0x34] sm:$0xf]  ;;  %v1921_v53 = vld [vmem:[#allocation5 + $0x38] sm:$0xf0]  ;;  %v1920_v56 = vor.u32 %v2192_v48, %v1919_v47 }
  0x3b   : > { %732 = vmatpush.bf16.msra.mxu2 %v1940_v34  ;;  %v2207_v54 = vld [vmem:[#allocation5 + $0xb4] sm:$0xf]  ;;  %v1985_v55 = vld [vmem:[#allocation5 + $0xb8] sm:$0xf0]  ;;  %v1984_v57 = vor.u32 %v2208_v51, %v1983_v49  ;;  %v1924_v58 = vor.u32 %v2191_v52, %v1921_v53  ;;  %v1911_v59 = vld [vmem:[#allocation5 + $0x20] sm:$0xf] }
  0x3c   : > { %781 = vmatpush.bf16.msra.mxu3 %v2004_v38  ;;  %v2190_v60 = vld [vmem:[#allocation5 + $0x24] sm:$0xf0]  ;;  %v1975_v61 = vld [vmem:[#allocation5 + $0xa0] sm:$0xf]  ;;  %v1988_v62 = vor.u32 %v2207_v54, %v1985_v55  ;;  %v2189_v0 = vld [vmem:[#allocation5 + $0x24] sm:$0xf] }
  0x3d   : > { %635 = vmatpush.bf16.msra.mxu0 %v1928_v44  ;;  %v2206_v63 = vld [vmem:[#allocation5 + $0xa4] sm:$0xf0]  ;;  %v1913_v1 = vld [vmem:[#allocation5 + $0x28] sm:$0xf0]  ;;  %v2205_v2 = vld [vmem:[#allocation5 + $0xa4] sm:$0xf]  ;;  %v1912_v4 = vor.u32 %v2190_v60, %v1911_v59 }
  0x3e   : > { %684 = vmatpush.bf16.msra.mxu1 %v1992_v45  ;;  %v1977_v3 = vld [vmem:[#allocation5 + $0xa8] sm:$0xf0]  ;;  %v1976_v5 = vor.u32 %v2206_v63, %v1975_v61  ;;  %v1916_v6 = vor.u32 %v2189_v0, %v1913_v1  ;;  %v1903_v7 = vld [vmem:[#allocation5 + $0x10] sm:$0xf]  ;;  %v2188_v8 = vld [vmem:[#allocation5 + $0x14] sm:$0xf0] }
  0x3f   : > { %733 = vmatpush.bf16.msra.mxu2 %v1932_v46  ;;  %v1967_v9 = vld [vmem:[#allocation5 + $0x90] sm:$0xf]  ;;  %v1980_v10 = vor.u32 %v2205_v2, %v1977_v3  ;;  %v2204_v11 = vld [vmem:[#allocation5 + $0x94] sm:$0xf0]  ;;  %v2187_v12 = vld [vmem:[#allocation5 + $0x14] sm:$0xf]  ;;  %v1904_v16 = vor.u32 %v2188_v8, %v1903_v7 }
  0x40   : > { %782 = vmatpush.bf16.msra.mxu3 %v1996_v50  ;;  %v1905_v13 = vld [vmem:[#allocation5 + $0x18] sm:$0xf0]  ;;  %v2203_v14 = vld [vmem:[#allocation5 + $0x94] sm:$0xf]  ;;  %v1895_v17 = vld [vmem:[#allocation5] sm:$0xf]  ;;  %v1968_v19 = vor.u32 %v2204_v11, %v1967_v9 }
  0x41   : > { %636 = vmatpush.bf16.msra.mxu0 %v1920_v56  ;;  %v1969_v15 = vld [vmem:[#allocation5 + $0x98] sm:$0xf0]  ;;  %v2186_v18 = vld [vmem:[#allocation5 + $0x4] sm:$0xf0]  ;;  %v1908_v20 = vor.u32 %v2187_v12, %v1905_v13  ;;  %v1959_v21 = vld [vmem:[#allocation5 + $0x80] sm:$0xf] }
  0x42   : > { %685 = vmatpush.bf16.msra.mxu1 %v1984_v57  ;;  %v2202_v22 = vld [vmem:[#allocation5 + $0x84] sm:$0xf0]  ;;  %v2185_v23 = vld [vmem:[#allocation5 + $0x4] sm:$0xf]  ;;  %v1972_v24 = vor.u32 %v2203_v14, %v1969_v15  ;;  %v1897_v25 = vld [vmem:[#allocation5 + $0x8] sm:$0xf0]  ;;  %v1896_v31 = vor.u32 %v2186_v18, %v1895_v17 }
  0x43   : > { %734 = vmatpush.bf16.msra.mxu2 %v1924_v58  ;;  %v2201_v26 = vld [vmem:[#allocation5 + $0x84] sm:$0xf]  ;;  %v1961_v27 = vld [vmem:[#allocation5 + $0x88] sm:$0xf0]  ;;  %v1831_v28 = vld [vmem:[%s2644_s11] sm:$0xf]  ;;  %v1960_v35 = vor.u32 %v2202_v22, %v1959_v21  ;;  %v1900_v36 = vor.u32 %v2185_v23, %v1897_v25 }
  0x44   : > { %783 = vmatpush.bf16.msra.mxu3 %v1988_v62  ;;  %v2231_v29 = vld [vmem:[#allocation7 + $0x74] sm:$0xf]  ;;  %v2081_v30 = vld [vmem:[#allocation7 + $0x78] sm:$0xf0]  ;;  %v2170_v32 = vld [vmem:[%s2644_s11 + $0x4] sm:$0xf0]  ;;  %v1964_v39 = vor.u32 %v2201_v26, %v1961_v27 }
  0x45   : > { %637 = vmatpush.bf16.msra.mxu0 %v1912_v4  ;;  %v2247_v33 = vld [vmem:[#allocation7 + $0xf4] sm:$0xf]  ;;  %v2145_v34 = vld [vmem:[#allocation7 + $0xf8] sm:$0xf0]  ;;  %v2169_v37 = vld [vmem:[%s2644_s11 + $0x4] sm:$0xf]  ;;  %v2084_v40 = vor.u32 %v2231_v29, %v2081_v30  ;;  %v1832_v43 = vor.u32 %v2170_v32, %v1831_v28 }
  0x46   : > { %686 = vmatpush.bf16.msra.mxu1 %v1976_v5  ;;  %v1833_v38 = vld [vmem:[%s2644_s11 + $0x8] sm:$0xf0]  ;;  %v2079_v41 = vld [vmem:[#allocation7 + $0x70] sm:$0xf]  ;;  %v2232_v42 = vld [vmem:[#allocation7 + $0x74] sm:$0xf0]  ;;  %v2148_v44 = vor.u32 %v2247_v33, %v2145_v34 }
  0x47   : > { %735 = vmatpush.bf16.msra.mxu2 %v1916_v6  ;;  %v2143_v45 = vld [vmem:[#allocation7 + $0xf0] sm:$0xf]  ;;  %v2248_v46 = vld [vmem:[#allocation7 + $0xf4] sm:$0xf0]  ;;  %v1836_v47 = vor.u32 %v2169_v37, %v1833_v38  ;;  %v2080_v48 = vor.u32 %v2232_v42, %v2079_v41  ;;  %v2229_v50 = vld [vmem:[#allocation7 + $0x64] sm:$0xf] }
  0x48   : > { %784 = vmatpush.bf16.msra.mxu3 %v1980_v10  ;;  %v2144_v49 = vor.u32 %v2248_v46, %v2143_v45  ;;  %v2073_v51 = vld [vmem:[#allocation7 + $0x68] sm:$0xf0]  ;;  %v2245_v52 = vld [vmem:[#allocation7 + $0xe4] sm:$0xf]  ;;  %v2071_v55 = vld [vmem:[#allocation7 + $0x60] sm:$0xf] }
  0x49   : > { %638 = vmatpush.bf16.msra.mxu0 %v1904_v16  ;;  %v2076_v53 = vor.u32 %v2229_v50, %v2073_v51  ;;  %v2137_v54 = vld [vmem:[#allocation7 + $0xe8] sm:$0xf0]  ;;  %v2230_v56 = vld [vmem:[#allocation7 + $0x64] sm:$0xf0]  ;;  %v2135_v59 = vld [vmem:[#allocation7 + $0xe0] sm:$0xf] }
  0x4a   : > { %687 = vmatpush.bf16.msra.mxu1 %v1968_v19  ;;  %v2140_v57 = vor.u32 %v2245_v52, %v2137_v54  ;;  %v2072_v58 = vor.u32 %v2230_v56, %v2071_v55  ;;  %v2246_v60 = vld [vmem:[#allocation7 + $0xe4] sm:$0xf0]  ;;  %v1839_v62 = vld [vmem:[%s2644_s11 + $0x10] sm:$0xf]  ;;  %v2172_v63 = vld [vmem:[%s2644_s11 + $0x14] sm:$0xf0] }
  0x4b   : > { %736 = vmatpush.bf16.msra.mxu2 %v1908_v20  ;;  %v2136_v61 = vor.u32 %v2246_v60, %v2135_v59  ;;  %v2171_v0 = vld [vmem:[%s2644_s11 + $0x14] sm:$0xf]  ;;  %v1841_v1 = vld [vmem:[%s2644_s11 + $0x18] sm:$0xf0]  ;;  %v1840_v2 = vor.u32 %v2172_v63, %v1839_v62  ;;  %v2063_v9 = vld [vmem:[#allocation7 + $0x50] sm:$0xf] }
  0x4c   : > { %785 = vmatpush.bf16.msra.mxu3 %v1972_v24  ;;  %v1844_v3 = vor.u32 %v2171_v0, %v1841_v1  ;;  %v2227_v4 = vld [vmem:[#allocation7 + $0x54] sm:$0xf]  ;;  %v2065_v5 = vld [vmem:[#allocation7 + $0x58] sm:$0xf0]  ;;  %v2228_v10 = vld [vmem:[#allocation7 + $0x54] sm:$0xf0] }
  0x4d   : > { %639 = vmatpush.bf16.msra.mxu0 %v1896_v31  ;;  %v2243_v6 = vld [vmem:[#allocation7 + $0xd4] sm:$0xf]  ;;  %v2068_v7 = vor.u32 %v2227_v4, %v2065_v5  ;;  %v2129_v8 = vld [vmem:[#allocation7 + $0xd8] sm:$0xf0]  ;;  %v2064_v12 = vor.u32 %v2228_v10, %v2063_v9  ;;  %v2127_v13 = vld [vmem:[#allocation7 + $0xd0] sm:$0xf] }
  0x4e   : > { %688 = vmatpush.bf16.msra.mxu1 %v1960_v35  ;;  %v2132_v11 = vor.u32 %v2243_v6, %v2129_v8  ;;  %v2244_v14 = vld [vmem:[#allocation7 + $0xd4] sm:$0xf0]  ;;  %v1847_v16 = vld [vmem:[%s2644_s11 + $0x20] sm:$0xf]  ;;  %v2174_v17 = vld [vmem:[%s2644_s11 + $0x24] sm:$0xf0] }
  0x4f   : > { %737 = vmatpush.bf16.msra.mxu2 %v1900_v36  ;;  %v2128_v15 = vor.u32 %v2244_v14, %v2127_v13  ;;  %v2173_v18 = vld [vmem:[%s2644_s11 + $0x24] sm:$0xf]  ;;  %v1849_v19 = vld [vmem:[%s2644_s11 + $0x28] sm:$0xf0]  ;;  %v1848_v20 = vor.u32 %v2174_v17, %v1847_v16  ;;  %v2055_v27 = vld [vmem:[#allocation7 + $0x40] sm:$0xf] }
  0x50   : > { %786 = vmatpush.bf16.msra.mxu3 %v1964_v39  ;;  %640 = vmatmul.bf16.vlgmr.msra.gmra.mxu0 %v1832_v43  ;;  %v1852_v21 = vor.u32 %v2173_v18, %v1849_v19  ;;  %v2225_v22 = vld [vmem:[#allocation7 + $0x44] sm:$0xf]  ;;  %v2057_v23 = vld [vmem:[#allocation7 + $0x48] sm:$0xf0]  ;;  %v2226_v28 = vld [vmem:[#allocation7 + $0x44] sm:$0xf0] }
  0x51   : > { %689 = vmatmul.bf16.vlgmr.msra.gmra.mxu1 %v1836_v47  ;;  %1074 = vmatpush.bf16.msrb.mxu0 %v2080_v48  ;;  %v2241_v24 = vld [vmem:[#allocation7 + $0xc4] sm:$0xf]  ;;  %v2060_v25 = vor.u32 %v2225_v22, %v2057_v23  ;;  %v2121_v26 = vld [vmem:[#allocation7 + $0xc8] sm:$0xf0]  ;;  %v2056_v30 = vor.u32 %v2226_v28, %v2055_v27  ;;  %v2119_v31 = vld [vmem:[#allocation7 + $0xc0] sm:$0xf] }
  0x52   : > { %738 = vmatmul.bf16.vlgmr.msra.gmra.mxu2 %v1832_v43  ;;  %1123 = vmatpush.bf16.msrb.mxu1 %v2144_v49  ;;  %v2124_v29 = vor.u32 %v2241_v24, %v2121_v26  ;;  %v2242_v32 = vld [vmem:[#allocation7 + $0xc4] sm:$0xf0]  ;;  %v1855_v34 = vld [vmem:[%s2644_s11 + $0x30] sm:$0xf]  ;;  %v2176_v35 = vld [vmem:[%s2644_s11 + $0x34] sm:$0xf0] }
  0x53   : > { %1172 = vmatpush.bf16.msrb.mxu2 %v2084_v40  ;;  %787 = vmatmul.bf16.vlgmr.msra.gmra.mxu3 %v1836_v47  ;;  %v2120_v33 = vor.u32 %v2242_v32, %v2119_v31  ;;  %v2175_v36 = vld [vmem:[%s2644_s11 + $0x34] sm:$0xf]  ;;  %v1857_v37 = vld [vmem:[%s2644_s11 + $0x38] sm:$0xf0]  ;;  %v1856_v38 = vor.u32 %v2176_v35, %v1855_v34  ;;  %v2047_v45 = vld [vmem:[#allocation7 + $0x30] sm:$0xf] }
  0x54   : > { %1221 = vmatpush.bf16.msrb.mxu3 %v2148_v44  ;;  %v1860_v39 = vor.u32 %v2175_v36, %v1857_v37  ;;  %v2223_v40 = vld [vmem:[#allocation7 + $0x34] sm:$0xf]  ;;  %v2049_v41 = vld [vmem:[#allocation7 + $0x38] sm:$0xf0]  ;;  %v2224_v46 = vld [vmem:[#allocation7 + $0x34] sm:$0xf0] }
  0x55   : > { %1075 = vmatpush.bf16.msrb.mxu0 %v2072_v58  ;;  %v2239_v42 = vld [vmem:[#allocation7 + $0xb4] sm:$0xf]  ;;  %v2052_v43 = vor.u32 %v2223_v40, %v2049_v41  ;;  %v2113_v44 = vld [vmem:[#allocation7 + $0xb8] sm:$0xf0]  ;;  %v2048_v48 = vor.u32 %v2224_v46, %v2047_v45  ;;  %v2111_v49 = vld [vmem:[#allocation7 + $0xb0] sm:$0xf] }
  0x56   : > { %1124 = vmatpush.bf16.msrb.mxu1 %v2136_v61  ;;  %v2116_v47 = vor.u32 %v2239_v42, %v2113_v44  ;;  %v2240_v50 = vld [vmem:[#allocation7 + $0xb4] sm:$0xf0]  ;;  %v1863_v52 = vld [vmem:[%s2644_s11 + $0x40] sm:$0xf]  ;;  %v2177_v54 = vld [vmem:[%s2644_s11 + $0x44] sm:$0xf] }
  0x57   : > { %1173 = vmatpush.bf16.msrb.mxu2 %v2076_v53  ;;  %v2112_v51 = vor.u32 %v2240_v50, %v2111_v49  ;;  %v2178_v53 = vld [vmem:[%s2644_s11 + $0x44] sm:$0xf0]  ;;  %v1865_v55 = vld [vmem:[%s2644_s11 + $0x48] sm:$0xf0]  ;;  %v2221_v58 = vld [vmem:[#allocation7 + $0x24] sm:$0xf] }
  0x58   : > { %1222 = vmatpush.bf16.msrb.mxu3 %v2140_v57  ;;  %v1864_v56 = vor.u32 %v2178_v53, %v1863_v52  ;;  %v1868_v57 = vor.u32 %v2177_v54, %v1865_v55  ;;  %v2041_v59 = vld [vmem:[#allocation7 + $0x28] sm:$0xf0]  ;;  %v2237_v60 = vld [vmem:[#allocation7 + $0xa4] sm:$0xf]  ;;  %v2039_v63 = vld [vmem:[#allocation7 + $0x20] sm:$0xf] }
  0x59   : > { %1076 = vmatpush.bf16.msrb.mxu0 %v2064_v12  ;;  %v2044_v61 = vor.u32 %v2221_v58, %v2041_v59  ;;  %v2105_v62 = vld [vmem:[#allocation7 + $0xa8] sm:$0xf0]  ;;  %v2222_v0 = vld [vmem:[#allocation7 + $0x24] sm:$0xf0]  ;;  %v1871_v6 = vld [vmem:[%s2644_s11 + $0x50] sm:$0xf] }
  0x5a   : > { %1125 = vmatpush.bf16.msrb.mxu1 %v2128_v15  ;;  %v2108_v1 = vor.u32 %v2237_v60, %v2105_v62  ;;  %v2238_v4 = vld [vmem:[#allocation7 + $0xa4] sm:$0xf0]  ;;  %v2179_v8 = vld [vmem:[%s2644_s11 + $0x54] sm:$0xf]  ;;  %v1873_v9 = vld [vmem:[%s2644_s11 + $0x58] sm:$0xf0] }
  0x5b   : > { %1174 = vmatpush.bf16.msrb.mxu2 %v2068_v7  ;;  %v2180_v7 = vld [vmem:[%s2644_s11 + $0x54] sm:$0xf0]  ;;  %v2219_v12 = vld [vmem:[#allocation7 + $0x14] sm:$0xf]  ;;  %v2033_v13 = vld [vmem:[#allocation7 + $0x18] sm:$0xf0] }
  0x5c   : > { %1223 = vmatpush.bf16.msrb.mxu3 %v2132_v11  ;;  %v1872_v10 = vor.u32 %v2180_v7, %v1871_v6  ;;  %v1876_v11 = vor.u32 %v2179_v8, %v1873_v9  ;;  %v2235_v14 = vld [vmem:[#allocation7 + $0x94] sm:$0xf]  ;;  %v2036_v15 = vor.u32 %v2219_v12, %v2033_v13  ;;  %v2097_v16 = vld [vmem:[#allocation7 + $0x98] sm:$0xf0]  ;;  %v2031_v17 = vld [vmem:[#allocation7 + $0x10] sm:$0xf] }
  0x5d   : > { %1077 = vmatpush.bf16.msrb.mxu0 %v2056_v30  ;;  %v2220_v18 = vld [vmem:[#allocation7 + $0x14] sm:$0xf0]  ;;  %v2100_v19 = vor.u32 %v2235_v14, %v2097_v16  ;;  %v1879_v24 = vld [vmem:[%s2644_s11 + $0x60] sm:$0xf]  ;;  %v2181_v26 = vld [vmem:[%s2644_s11 + $0x64] sm:$0xf] }
  0x5e   : > { %1126 = vmatpush.bf16.msrb.mxu1 %v2120_v33  ;;  %v2236_v22 = vld [vmem:[#allocation7 + $0x94] sm:$0xf0]  ;;  %v1881_v27 = vld [vmem:[%s2644_s11 + $0x68] sm:$0xf0]  ;;  %v2217_v30 = vld [vmem:[#allocation7 + $0x4] sm:$0xf] }
  0x5f   : > { %1175 = vmatpush.bf16.msrb.mxu2 %v2060_v25  ;;  %v2182_v25 = vld [vmem:[%s2644_s11 + $0x64] sm:$0xf0]  ;;  %v2025_v31 = vld [vmem:[#allocation7 + $0x8] sm:$0xf0]  ;;  %v1887_v33 = vld [vmem:[%s2644_s11 + $0x70] sm:$0xf] }
  0x60   : > { %645 = vmatmul.bf16.gmra.mxu0 %v1840_v2  ;;  %1224 = vmatpush.bf16.msrb.mxu3 %v2124_v29  ;;  %v1880_v28 = vor.u32 %v2182_v25, %v1879_v24  ;;  %v1884_v29 = vor.u32 %v2181_v26, %v1881_v27  ;;  %v2028_v32 = vor.u32 %v2217_v30, %v2025_v31  ;;  %v2184_v34 = vld [vmem:[%s2644_s11 + $0x74] sm:$0xf0]  ;;  %v2183_v35 = vld [vmem:[%s2644_s11 + $0x74] sm:$0xf]  ;;  %v1889_v36 = vld [vmem:[%s2644_s11 + $0x78] sm:$0xf0] }
  0x61   : > { %694 = vmatmul.bf16.gmra.mxu1 %v1844_v3  ;;  %1078 = vmatpush.bf16.msrb.mxu0 %v2048_v48  ;;  %v2233_v37 = vld [vmem:[#allocation7 + $0x84] sm:$0xf]  ;;  %v2023_v40 = vld [vmem:[#allocation7] sm:$0xf]  ;;  %v2218_v41 = vld [vmem:[#allocation7 + $0x4] sm:$0xf0]  ;;  %v1888_v45 = vor.u32 %v2184_v34, %v1887_v33 }
  0x62   : > { %743 = vmatmul.bf16.gmra.mxu2 %v1840_v2  ;;  %1127 = vmatpush.bf16.msrb.mxu1 %v2112_v51  ;;  %v2040_v2 = vor.u32 %v2222_v0, %v2039_v63  ;;  %v2087_v42 = vld [vmem:[#allocation7 + $0x80] sm:$0xf]  ;;  %v2234_v44 = vld [vmem:[#allocation7 + $0x84] sm:$0xf0]  ;;  %s1388_s17 = sld [smem:[#allocation2]]  ;;  %s1827_s20 = sshll.u32 %s1813_s6, 4 }
  0x63   : > { %792 = vmatmul.bf16.gmra.mxu3 %v1844_v3  ;;  %1176 = vmatpush.bf16.msrb.mxu2 %v2052_v43  ;;  %v2103_v3 = vld [vmem:[#allocation7 + $0xa0] sm:$0xf]  ;;  %v2024_v43 = vor.u32 %v2218_v41, %v2023_v40  ;;  %v2088_v46 = vor.u32 %v2234_v44, %v2087_v42  ;;  %p333_p1 = scmp.lt.s32.totalorder %s1827_s20, 31  ;;  %vm1710_vm2 = vcmask 7168  }
  0x64   : > { %1225 = vmatpush.bf16.msrb.mxu3 %v2116_v47  ;;  %v2104_v5 = vor.u32 %v2238_v4, %v2103_v3  ;;  %v1892_v47 = vor.u32 %v2183_v35, %v1889_v36  ;;  %v386_v48 = vld [vmem:[%s2875_s2] sm:$0x3] }
  0x65   : > { %1079 = vmatpush.bf16.msrb.mxu0 %v2040_v2  ;;  %v2689_v50 = vperm.slane %v386_v48, 0  ;;  %v2692_v54 = vperm.slane %v386_v48, 1  ;;  %s2891_s20 = smov (!%p333_p1, %s1827_s20), 31 }
  0x66   : > { %1128 = vmatpush.bf16.msrb.mxu1 %v2104_v5  ;;  %s1828_s21 = sshll.u32 %s2891_s20, 3 }
  0x67   : > { %1177 = vmatpush.bf16.msrb.mxu2 %v2044_v61  ;;  %s2814_s23 = scalar_lea.vmem %s2880_s7, %s1828_s21 }
  0x68   : > { %1226 = vmatpush.bf16.msrb.mxu3 %v2108_v1 }
  0x6b   : > { %1178 = vmatpush.bf16.msrb.mxu2 %v2036_v15 }
  0x6c   : > { %1227 = vmatpush.bf16.msrb.mxu3 %v2100_v19 }
  0x6f   : > { %1179 = vmatpush.bf16.msrb.mxu2 %v2028_v32 }
  0x70   : > { %650 = vmatmul.bf16.gmra.mxu0 %v1848_v20 }
  0x71   : > { %699 = vmatmul.bf16.gmra.mxu1 %v1852_v21 }
  0x72   : > { %748 = vmatmul.bf16.gmra.mxu2 %v1848_v20  ;;  %v2032_v20 = vor.u32 %v2220_v18, %v2031_v17 }
  0x73   : > { %797 = vmatmul.bf16.gmra.mxu3 %v1852_v21  ;;  %v2095_v21 = vld [vmem:[#allocation7 + $0x90] sm:$0xf] }
  0x74   : > { %v2096_v23 = vor.u32 %v2236_v22, %v2095_v21  ;;  %1080 = vmatpush.bf16.msrb.mxu0 %v2032_v20 }
  0x76   : > { %1129 = vmatpush.bf16.msrb.mxu1 %v2096_v23 }
  0x78   : > { %1081 = vmatpush.bf16.msrb.mxu0 %v2024_v43 }
  0x7a   : > { %1130 = vmatpush.bf16.msrb.mxu1 %v2088_v46 }
  0x80   : > { %655 = vmatmul.bf16.gmra.mxu0 %v1856_v38 }
  0x81   : > { %704 = vmatmul.bf16.gmra.mxu1 %v1860_v39 }
  0x82   : > { %753 = vmatmul.bf16.gmra.mxu2 %v1856_v38  ;;  %v2089_v38 = vld [vmem:[#allocation7 + $0x88] sm:$0xf0] }
  0x83   : > { %802 = vmatmul.bf16.gmra.mxu3 %v1860_v39  ;;  %v2092_v39 = vor.u32 %v2233_v37, %v2089_v38 }
  0x85   : > { %1228 = vmatpush.bf16.msrb.mxu3 %v2092_v39 }
  0x90   : > { %660 = vmatmul.bf16.gmra.mxu0 %v1864_v56 }
  0x91   : > { %709 = vmatmul.bf16.gmra.mxu1 %v1868_v57 }
  0x92   : > { %758 = vmatmul.bf16.gmra.mxu2 %v1864_v56 }
  0x93   : > { %807 = vmatmul.bf16.gmra.mxu3 %v1868_v57 }
  0xa0   : > { %665 = vmatmul.bf16.gmra.mxu0 %v1872_v10 }
  0xa1   : > { %714 = vmatmul.bf16.gmra.mxu1 %v1876_v11 }
  0xa2   : > { %763 = vmatmul.bf16.gmra.mxu2 %v1872_v10 }
  0xa3   : > { %812 = vmatmul.bf16.gmra.mxu3 %v1876_v11 }
  0xb0   : > { %670 = vmatmul.bf16.gmra.mxu0 %v1880_v28 }
  0xb1   : > { %719 = vmatmul.bf16.gmra.mxu1 %v1884_v29 }
  0xb2   : > { %768 = vmatmul.bf16.gmra.mxu2 %v1880_v28 }
  0xb3   : > { %817 = vmatmul.bf16.gmra.mxu3 %v1884_v29 }
  0xc0   : > { %675 = vmatmul.bf16.gmra.mxu0 %v1888_v45 }
  0xc1   : > { %724 = vmatmul.bf16.gmra.mxu1 %v1892_v47 }
  0xc2   : > { %773 = vmatmul.bf16.gmra.mxu2 %v1888_v45 }
  0xc3   : > { %822 = vmatmul.bf16.gmra.mxu3 %v1892_v47 }
  0xcd   : > { %v641_v49 = vpop.f32.mrf.mxu0 }
  0xce   : > { %v690_v51 = vpop.f32.mrf.mxu1  ;;  %v642_v52 = vadd.f32 %v641_v49, %v2689_v50 }
  0xd0   : > { %v691_v57 = vadd.f32 %v690_v51, %v642_v52 }
  0xd2   : > { %v828_v62 = vmax.f32 %v691_v57, 0.0 }
  0xd5   : > { %v739_v53 = vpop.f32.mrf.mxu2  ;;  %v643_v56 = vpop.f32.mrf.mxu0 }
  0xd6   : > { %v788_v55 = vpop.f32.mrf.mxu3  ;;  %v644_v58 = vadd.f32 %v643_v56, %v2689_v50  ;;  %v692_v59 = vpop.f32.mrf.mxu1  ;;  %v740_v61 = vadd.f32 %v739_v53, %v2692_v54 }
  0xd8   : > { %v693_v60 = vadd.f32 %v692_v59, %v644_v58  ;;  %v789_v2 = vadd.f32 %v788_v55, %v740_v61 }
  0xda   : > { %v830_v63 = vmax.f32 %v693_v60, 0.0  ;;  %v829_v8 = vmax.f32 %v789_v2, 0.0 }
  0xdc   : > { %v860_v1 = vpack.c.bf16 %v830_v63, %v828_v62 }
  0xdd   : > { %v741_v0 = vpop.f32.mrf.mxu2  ;;  %v646_v5 = vpop.f32.mrf.mxu0 }
  0xde   : > { %v742_v3 = vadd.f32 %v741_v0, %v2692_v54  ;;  %v790_v4 = vpop.f32.mrf.mxu3  ;;  %v695_v6 = vpop.f32.mrf.mxu1  ;;  %1082 = vmatmul.bf16.vlgmr.msrb.gmra.mxu0 %v860_v1  ;;  %1180 = vmatmul.bf16.vlgmr.msrb.gmra.mxu2 %v860_v1  ;;  %v647_v10 = vadd.f32 %v646_v5, %v2689_v50 }
  0xe0   : > { %v791_v7 = vadd.f32 %v790_v4, %v742_v3  ;;  %v696_v15 = vadd.f32 %v695_v6, %v647_v10 }
  0xe2   : > { %v831_v9 = vmax.f32 %v791_v7, 0.0  ;;  %v832_v20 = vmax.f32 %v696_v15, 0.0 }
  0xe4   : > { %v861_v11 = vpack.c.bf16 %v831_v9, %v829_v8 }
  0xe5   : > { %v744_v12 = vpop.f32.mrf.mxu2  ;;  %v648_v14 = vpop.f32.mrf.mxu0 }
  0xe6   : > { %v793_v13 = vpop.f32.mrf.mxu3  ;;  %1131 = vmatmul.bf16.vlgmr.msrb.gmra.mxu1 %v861_v11  ;;  %1229 = vmatmul.bf16.vlgmr.msrb.gmra.mxu3 %v861_v11  ;;  %v649_v16 = vadd.f32 %v648_v14, %v2689_v50  ;;  %v697_v17 = vpop.f32.mrf.mxu1  ;;  %v745_v19 = vadd.f32 %v744_v12, %v2692_v54 }
  0xe8   : > { %v698_v18 = vadd.f32 %v697_v17, %v649_v16  ;;  %v794_v24 = vadd.f32 %v793_v13, %v745_v19 }
  0xea   : > { %v834_v21 = vmax.f32 %v698_v18, 0.0  ;;  %v833_v30 = vmax.f32 %v794_v24, 0.0 }
  0xec   : > { %v862_v23 = vpack.c.bf16 %v834_v21, %v832_v20 }
  0xed   : > { %v746_v22 = vpop.f32.mrf.mxu2  ;;  %v651_v27 = vpop.f32.mrf.mxu0 }
  0xee   : > { %v747_v25 = vadd.f32 %v746_v22, %v2692_v54  ;;  %v795_v26 = vpop.f32.mrf.mxu3  ;;  %v700_v28 = vpop.f32.mrf.mxu1  ;;  %1087 = vmatmul.bf16.gmra.mxu0 %v862_v23  ;;  %1185 = vmatmul.bf16.gmra.mxu2 %v862_v23  ;;  %v652_v32 = vadd.f32 %v651_v27, %v2689_v50 }
  0xf0   : > { %v796_v29 = vadd.f32 %v795_v26, %v747_v25  ;;  %v701_v37 = vadd.f32 %v700_v28, %v652_v32 }
  0xf2   : > { %v835_v31 = vmax.f32 %v796_v29, 0.0  ;;  %v836_v42 = vmax.f32 %v701_v37, 0.0 }
  0xf4   : > { %v863_v33 = vpack.c.bf16 %v835_v31, %v833_v30 }
  0xf5   : > { %v749_v34 = vpop.f32.mrf.mxu2  ;;  %v653_v36 = vpop.f32.mrf.mxu0 }
  0xf6   : > { %v798_v35 = vpop.f32.mrf.mxu3  ;;  %1136 = vmatmul.bf16.gmra.mxu1 %v863_v33  ;;  %1234 = vmatmul.bf16.gmra.mxu3 %v863_v33  ;;  %v654_v38 = vadd.f32 %v653_v36, %v2689_v50  ;;  %v702_v39 = vpop.f32.mrf.mxu1  ;;  %v750_v41 = vadd.f32 %v749_v34, %v2692_v54 }
  0xf8   : > { %v703_v40 = vadd.f32 %v702_v39, %v654_v38  ;;  %v799_v46 = vadd.f32 %v798_v35, %v750_v41 }
  0xfa   : > { %v838_v43 = vmax.f32 %v703_v40, 0.0  ;;  %v837_v53 = vmax.f32 %v799_v46, 0.0 }
  0xfc   : > { %v864_v45 = vpack.c.bf16 %v838_v43, %v836_v42 }
  0xfd   : > { %v751_v44 = vpop.f32.mrf.mxu2  ;;  %v656_v49 = vpop.f32.mrf.mxu0 }
  0xfe   : > { %v752_v47 = vadd.f32 %v751_v44, %v2692_v54  ;;  %v800_v48 = vpop.f32.mrf.mxu3  ;;  %v705_v51 = vpop.f32.mrf.mxu1  ;;  %1092 = vmatmul.bf16.gmra.mxu0 %v864_v45  ;;  %1190 = vmatmul.bf16.gmra.mxu2 %v864_v45  ;;  %v657_v56 = vadd.f32 %v656_v49, %v2689_v50 }
 0x100   : > { %v801_v52 = vadd.f32 %v800_v48, %v752_v47  ;;  %v706_v61 = vadd.f32 %v705_v51, %v657_v56 }
 0x102   : > { %v839_v55 = vmax.f32 %v801_v52, 0.0  ;;  %v840_v2 = vmax.f32 %v706_v61, 0.0 }
 0x104   : > { %v865_v57 = vpack.c.bf16 %v839_v55, %v837_v53 }
 0x105   : > { %v754_v58 = vpop.f32.mrf.mxu2  ;;  %v658_v60 = vpop.f32.mrf.mxu0 }
 0x106   : > { %v803_v59 = vpop.f32.mrf.mxu3  ;;  %1141 = vmatmul.bf16.gmra.mxu1 %v865_v57  ;;  %1239 = vmatmul.bf16.gmra.mxu3 %v865_v57  ;;  %v659_v62 = vadd.f32 %v658_v60, %v2689_v50  ;;  %v707_v63 = vpop.f32.mrf.mxu1  ;;  %v755_v1 = vadd.f32 %v754_v58, %v2692_v54 }
 0x108   : > { %v708_v0 = vadd.f32 %v707_v63, %v659_v62  ;;  %v804_v6 = vadd.f32 %v803_v59, %v755_v1 }
 0x10a   : > { %v842_v3 = vmax.f32 %v708_v0, 0.0  ;;  %v841_v12 = vmax.f32 %v804_v6, 0.0 }
 0x10c   : > { %v866_v5 = vpack.c.bf16 %v842_v3, %v840_v2 }
 0x10d   : > { %v756_v4 = vpop.f32.mrf.mxu2  ;;  %v661_v9 = vpop.f32.mrf.mxu0 }
 0x10e   : > { %v757_v7 = vadd.f32 %v756_v4, %v2692_v54  ;;  %v805_v8 = vpop.f32.mrf.mxu3  ;;  %v710_v10 = vpop.f32.mrf.mxu1  ;;  %1097 = vmatmul.bf16.gmra.mxu0 %v866_v5  ;;  %1195 = vmatmul.bf16.gmra.mxu2 %v866_v5  ;;  %v662_v14 = vadd.f32 %v661_v9, %v2689_v50 }
 0x110   : > { %v806_v11 = vadd.f32 %v805_v8, %v757_v7  ;;  %v711_v19 = vadd.f32 %v710_v10, %v662_v14 }
 0x112   : > { %v843_v13 = vmax.f32 %v806_v11, 0.0  ;;  %v844_v24 = vmax.f32 %v711_v19, 0.0 }
 0x114   : > { %v867_v15 = vpack.c.bf16 %v843_v13, %v841_v12 }
 0x115   : > { %v759_v16 = vpop.f32.mrf.mxu2  ;;  %v663_v18 = vpop.f32.mrf.mxu0 }
 0x116   : > { %v808_v17 = vpop.f32.mrf.mxu3  ;;  %1146 = vmatmul.bf16.gmra.mxu1 %v867_v15  ;;  %1244 = vmatmul.bf16.gmra.mxu3 %v867_v15  ;;  %v664_v20 = vadd.f32 %v663_v18, %v2689_v50  ;;  %v712_v21 = vpop.f32.mrf.mxu1  ;;  %v760_v23 = vadd.f32 %v759_v16, %v2692_v54 }
 0x118   : > { %v713_v22 = vadd.f32 %v712_v21, %v664_v20  ;;  %v809_v28 = vadd.f32 %v808_v17, %v760_v23 }
 0x11a   : > { %v846_v25 = vmax.f32 %v713_v22, 0.0  ;;  %v845_v34 = vmax.f32 %v809_v28, 0.0 }
 0x11c   : > { %v868_v26 = vpack.c.bf16 %v846_v25, %v844_v24 }
 0x11d   : > { %v761_v27 = vpop.f32.mrf.mxu2  ;;  %v666_v31 = vpop.f32.mrf.mxu0 }
 0x11e   : > { %v762_v29 = vadd.f32 %v761_v27, %v2692_v54  ;;  %v810_v30 = vpop.f32.mrf.mxu3  ;;  %v715_v32 = vpop.f32.mrf.mxu1  ;;  %1102 = vmatmul.bf16.gmra.mxu0 %v868_v26  ;;  %1200 = vmatmul.bf16.gmra.mxu2 %v868_v26  ;;  %v667_v36 = vadd.f32 %v666_v31, %v2689_v50 }
 0x120   : > { %v811_v33 = vadd.f32 %v810_v30, %v762_v29  ;;  %v716_v41 = vadd.f32 %v715_v32, %v667_v36 }
 0x122   : > { %v847_v35 = vmax.f32 %v811_v33, 0.0  ;;  %v848_v46 = vmax.f32 %v716_v41, 0.0 }
 0x124   : > { %v869_v37 = vpack.c.bf16 %v847_v35, %v845_v34 }
 0x125   : > { %v764_v38 = vpop.f32.mrf.mxu2  ;;  %v668_v40 = vpop.f32.mrf.mxu0 }
 0x126   : > { %v813_v39 = vpop.f32.mrf.mxu3  ;;  %1151 = vmatmul.bf16.gmra.mxu1 %v869_v37  ;;  %1249 = vmatmul.bf16.gmra.mxu3 %v869_v37  ;;  %v669_v42 = vadd.f32 %v668_v40, %v2689_v50  ;;  %v717_v43 = vpop.f32.mrf.mxu1  ;;  %v765_v45 = vadd.f32 %v764_v38, %v2692_v54 }
 0x128   : > { %v718_v44 = vadd.f32 %v717_v43, %v669_v42  ;;  %v814_v51 = vadd.f32 %v813_v39, %v765_v45  ;;  %v908_v39 = vld [vmem:[%s2877_s4] sm:$0x3] }
 0x129   : > { %v2728_v40 = vperm.slane %v908_v39, 0  ;;  %v2731_v43 = vperm.slane %v908_v39, 1 }
 0x12a   : > { %v850_v47 = vmax.f32 %v718_v44, 0.0  ;;  %v849_v58 = vmax.f32 %v814_v51, 0.0 }
 0x12c   : > { %v870_v48 = vpack.c.bf16 %v850_v47, %v848_v46  ;;  %v1302_v46 = vld [vmem:[%s2878_s5] sm:$0x3] }
 0x12d   : > { %v766_v49 = vpop.f32.mrf.mxu2  ;;  %v671_v55 = vpop.f32.mrf.mxu0 }
 0x12e   : > { %v767_v52 = vadd.f32 %v766_v49, %v2692_v54  ;;  %v815_v53 = vpop.f32.mrf.mxu3  ;;  %v720_v56 = vpop.f32.mrf.mxu1  ;;  %1107 = vmatmul.bf16.gmra.mxu0 %v870_v48  ;;  %1205 = vmatmul.bf16.gmra.mxu2 %v870_v48  ;;  %v672_v60 = vadd.f32 %v671_v55, %v2689_v50  ;;  %v2739_v55 = vperm.slane %v1302_v46, 1 }
 0x130   : > { %v816_v57 = vadd.f32 %v815_v53, %v767_v52  ;;  %v721_v1 = vadd.f32 %v720_v56, %v672_v60  ;;  %v2737_v52 = vperm.slane %v1302_v46, 0 }
 0x132   : > { %v851_v59 = vmax.f32 %v816_v57, 0.0  ;;  %v852_v6 = vmax.f32 %v721_v1, 0.0 }
 0x134   : > { %v871_v61 = vpack.c.bf16 %v851_v59, %v849_v58 }
 0x135   : > { %v769_v62 = vpop.f32.mrf.mxu2  ;;  %v673_v0 = vpop.f32.mrf.mxu0 }
 0x136   : > { %v818_v63 = vpop.f32.mrf.mxu3  ;;  %1156 = vmatmul.bf16.gmra.mxu1 %v871_v61  ;;  %1254 = vmatmul.bf16.gmra.mxu3 %v871_v61  ;;  %v674_v2 = vadd.f32 %v673_v0, %v2689_v50  ;;  %v722_v3 = vpop.f32.mrf.mxu1  ;;  %v770_v5 = vadd.f32 %v769_v62, %v2692_v54 }
 0x138   : > { %v723_v4 = vadd.f32 %v722_v3, %v674_v2  ;;  %v819_v10 = vadd.f32 %v818_v63, %v770_v5 }
 0x13a   : > { %v854_v7 = vmax.f32 %v723_v4, 0.0  ;;  %v853_v16 = vmax.f32 %v819_v10, 0.0 }
 0x13c   : > { %v872_v8 = vpack.c.bf16 %v854_v7, %v852_v6 }
 0x13d   : > { %v771_v9 = vpop.f32.mrf.mxu2  ;;  %v676_v13 = vpop.f32.mrf.mxu0 }
 0x13e   : > { %v772_v11 = vadd.f32 %v771_v9, %v2692_v54  ;;  %v820_v12 = vpop.f32.mrf.mxu3  ;;  %v725_v14 = vpop.f32.mrf.mxu1  ;;  %1112 = vmatmul.bf16.gmra.mxu0 %v872_v8  ;;  %1210 = vmatmul.bf16.gmra.mxu2 %v872_v8  ;;  %v677_v18 = vadd.f32 %v676_v13, %v2689_v50 }
 0x140   : > { %v821_v15 = vadd.f32 %v820_v12, %v772_v11  ;;  %v726_v23 = vadd.f32 %v725_v14, %v677_v18 }
 0x142   : > { %v855_v17 = vmax.f32 %v821_v15, 0.0  ;;  %v856_v28 = vmax.f32 %v726_v23, 0.0 }
 0x144   : > { %v873_v19 = vpack.c.bf16 %v855_v17, %v853_v16 }
 0x145   : > { %v774_v20 = vpop.f32.mrf.mxu2  ;;  %v678_v22 = vpop.f32.mrf.mxu0 }
 0x146   : > { %v823_v21 = vpop.f32.mrf.mxu3  ;;  %1161 = vmatmul.bf16.gmra.mxu1 %v873_v19  ;;  %1259 = vmatmul.bf16.gmra.mxu3 %v873_v19  ;;  %v679_v24 = vadd.f32 %v678_v22, %v2689_v50  ;;  %v727_v25 = vpop.f32.mrf.mxu1  ;;  %v775_v27 = vadd.f32 %v774_v20, %v2692_v54 }
 0x148   : > { %v728_v26 = vadd.f32 %v727_v25, %v679_v24  ;;  %v824_v32 = vadd.f32 %v823_v21, %v775_v27 }
 0x14a   : > { %v858_v29 = vmax.f32 %v728_v26, 0.0  ;;  %v857_v36 = vmax.f32 %v824_v32, 0.0 }
 0x14c   : > { %v874_v30 = vpack.c.bf16 %v858_v29, %v856_v28 }
 0x14d   : > { %v776_v31 = vpop.f32.mrf.mxu2 }
 0x14e   : > { %v777_v33 = vadd.f32 %v776_v31, %v2692_v54  ;;  %v825_v34 = vpop.f32.mrf.mxu3  ;;  %1117 = vmatmul.bf16.gmra.mxu0 %v874_v30  ;;  %1215 = vmatmul.bf16.gmra.mxu2 %v874_v30 }
 0x150   : > { %v826_v35 = vadd.f32 %v825_v34, %v777_v33 }
 0x152   : > { %v859_v37 = vmax.f32 %v826_v35, 0.0 }
 0x154   : > { %v875_v38 = vpack.c.bf16 %v859_v37, %v857_v36 }
 0x156   : > { %1166 = vmatmul.bf16.gmra.mxu1 %v875_v38  ;;  %1264 = vmatmul.bf16.gmra.mxu3 %v875_v38 }
 0x15b   : > { %v1083_v50 = vpop.f32.mrf.mxu0 }
 0x15c   : > { %v1084_v54 = vadd.f32 %v1083_v50, %v2728_v40 }
 0x161   : > { %v1181_v41 = vpop.f32.mrf.mxu2 }
 0x162   : > { %v1182_v47 = vadd.f32 %v1181_v41, %v2731_v43 }
 0x163   : > { %v1132_v42 = vpop.f32.mrf.mxu1  ;;  %v1085_v44 = vpop.f32.mrf.mxu0 }
 0x164   : > { %v1133_v45 = vadd.f32 %v1132_v42, %v1084_v54  ;;  %v1086_v57 = vadd.f32 %v1085_v44, %v2728_v40 }
 0x166   : > { %v1270_v49 = vmax.f32 %v1133_v45, 0.0 }
 0x168   : > { %v1308_v61 = vmul.f32 %v2737_v52, %v1270_v49 }
 0x169   : > { %v1230_v48 = vpop.f32.mrf.mxu3  ;;  %v1183_v53 = vpop.f32.mrf.mxu2 }
 0x16a   : > { %v1231_v51 = vadd.f32 %v1230_v48, %v1182_v47  ;;  %v1184_v63 = vadd.f32 %v1183_v53, %v2731_v43 }
 0x16b   : > { %v1134_v56 = vpop.f32.mrf.mxu1  ;;  %v1088_v59 = vpop.f32.mrf.mxu0 }
 0x16c   : > { %v1271_v58 = vmax.f32 %v1231_v51, 0.0  ;;  %v1135_v60 = vadd.f32 %v1134_v56, %v1086_v57  ;;  %v1089_v6 = vadd.f32 %v1088_v59, %v2728_v40 }
 0x16e   : > { %v1309_v62 = vmul.f32 %v2739_v55, %v1271_v58  ;;  %v1272_v2 = vmax.f32 %v1135_v60, 0.0 }
 0x170   : > { %v1340_v0 = vadd.f32 %v1309_v62, %v1308_v61  ;;  %v1310_v9 = vmul.f32 %v2737_v52, %v1272_v2 }
 0x171   : > { %v1232_v1 = vpop.f32.mrf.mxu3  ;;  %v1186_v4 = vpop.f32.mrf.mxu2 }
 0x172   : > { %v1233_v3 = vadd.f32 %v1232_v1, %v1184_v63  ;;  %1341 = vadd.xlane.f32.xlu0 %v1340_v0  ;;  %v1187_v12 = vadd.f32 %v1186_v4, %v2731_v43 }
 0x173   : > { %v1137_v5 = vpop.f32.mrf.mxu1  ;;  %v1090_v8 = vpop.f32.mrf.mxu0 }
 0x174   : > { %v1273_v7 = vmax.f32 %v1233_v3, 0.0  ;;  %v1138_v11 = vadd.f32 %v1137_v5, %v1089_v6  ;;  %v1091_v19 = vadd.f32 %v1090_v8, %v2728_v40 }
 0x176   : > { %v1311_v10 = vmul.f32 %v2739_v55, %v1273_v7  ;;  %v1274_v15 = vmax.f32 %v1138_v11, 0.0 }
 0x178   : > { %v1343_v13 = vadd.f32 %v1311_v10, %v1310_v9  ;;  %v1312_v23 = vmul.f32 %v2737_v52, %v1274_v15 }
 0x179   : > { %v1235_v14 = vpop.f32.mrf.mxu3  ;;  %v1188_v17 = vpop.f32.mrf.mxu2 }
 0x17a   : > { %v1236_v16 = vadd.f32 %v1235_v14, %v1187_v12  ;;  %1344 = vadd.xlane.f32.xlu0 %v1343_v13  ;;  %v1189_v25 = vadd.f32 %v1188_v17, %v2731_v43 }
 0x17b   : > { %v1139_v18 = vpop.f32.mrf.mxu1  ;;  %v1093_v21 = vpop.f32.mrf.mxu0 }
 0x17c   : > { %v1275_v20 = vmax.f32 %v1236_v16, 0.0  ;;  %v1140_v22 = vadd.f32 %v1139_v18, %v1091_v19  ;;  %v1094_v32 = vadd.f32 %v1093_v21, %v2728_v40 }
 0x17e   : > { %v1313_v24 = vmul.f32 %v2739_v55, %v1275_v20  ;;  %v1276_v28 = vmax.f32 %v1140_v22, 0.0 }
 0x180   : > { %v1346_v26 = vadd.f32 %v1313_v24, %v1312_v23  ;;  %v1314_v35 = vmul.f32 %v2737_v52, %v1276_v28 }
 0x181   : > { %v1237_v27 = vpop.f32.mrf.mxu3  ;;  %v1191_v30 = vpop.f32.mrf.mxu2 }
 0x182   : > { %v1238_v29 = vadd.f32 %v1237_v27, %v1189_v25  ;;  %1347 = vadd.xlane.f32.xlu1 %v1346_v26  ;;  %v1192_v38 = vadd.f32 %v1191_v30, %v2731_v43 }
 0x183   : > { %v1142_v31 = vpop.f32.mrf.mxu1  ;;  %v1095_v34 = vpop.f32.mrf.mxu0 }
 0x184   : > { %v1277_v33 = vmax.f32 %v1238_v29, 0.0  ;;  %v1143_v37 = vadd.f32 %v1142_v31, %v1094_v32  ;;  %v1096_v45 = vadd.f32 %v1095_v34, %v2728_v40 }
 0x186   : > { %v1315_v36 = vmul.f32 %v2739_v55, %v1277_v33  ;;  %v1278_v41 = vmax.f32 %v1143_v37, 0.0 }
 0x188   : > { %v1349_v50 = vadd.f32 %v1315_v36, %v1314_v35  ;;  %v1316_v49 = vmul.f32 %v2737_v52, %v1278_v41 }
 0x189   : > { %v1240_v39 = vpop.f32.mrf.mxu3  ;;  %v1193_v54 = vpop.f32.mrf.mxu2 }
 0x18a   : > { %v1241_v42 = vadd.f32 %v1240_v39, %v1192_v38  ;;  %1350 = vadd.xlane.f32.xlu1 %v1349_v50  ;;  %v1194_v53 = vadd.f32 %v1193_v54, %v2731_v43 }
 0x18b   : > { %v1144_v44 = vpop.f32.mrf.mxu1  ;;  %v1098_v47 = vpop.f32.mrf.mxu0 }
 0x18c   : > { %v1279_v46 = vmax.f32 %v1241_v42, 0.0  ;;  %v1145_v48 = vadd.f32 %v1144_v44, %v1096_v45  ;;  %v1099_v62 = vadd.f32 %v1098_v47, %v2728_v40 }
 0x18e   : > { %v1317_v51 = vmul.f32 %v2739_v55, %v1279_v46  ;;  %v1280_v58 = vmax.f32 %v1145_v48, 0.0 }
 0x190   : > { %v1352_v56 = vadd.f32 %v1317_v51, %v1316_v49  ;;  %v1318_v1 = vmul.f32 %v2737_v52, %v1280_v58 }
 0x191   : > { %v1242_v57 = vpop.f32.mrf.mxu3  ;;  %v1196_v60 = vpop.f32.mrf.mxu2 }
 0x192   : > { %v1243_v59 = vadd.f32 %v1242_v57, %v1194_v53  ;;  %1353 = vadd.xlane.f32.xlu2 %v1352_v56  ;;  %v1197_v4 = vadd.f32 %v1196_v60, %v2731_v43 }
 0x193   : > { %v1147_v61 = vpop.f32.mrf.mxu1  ;;  %v1100_v0 = vpop.f32.mrf.mxu0 }
 0x194   : > { %v1281_v63 = vmax.f32 %v1243_v59, 0.0  ;;  %v1148_v3 = vadd.f32 %v1147_v61, %v1099_v62  ;;  %v1101_v11 = vadd.f32 %v1100_v0, %v2728_v40 }
 0x196   : > { %v1319_v2 = vmul.f32 %v2739_v55, %v1281_v63  ;;  %v1282_v7 = vmax.f32 %v1148_v3, 0.0 }
 0x198   : > { %v1355_v5 = vadd.f32 %v1319_v2, %v1318_v1  ;;  %v1320_v14 = vmul.f32 %v2737_v52, %v1282_v7 }
 0x199   : > { %v1245_v6 = vpop.f32.mrf.mxu3  ;;  %v1198_v9 = vpop.f32.mrf.mxu2 }
 0x19a   : > { %v1246_v8 = vadd.f32 %v1245_v6, %v1197_v4  ;;  %1356 = vadd.xlane.f32.xlu2 %v1355_v5  ;;  %v1199_v17 = vadd.f32 %v1198_v9, %v2731_v43 }
 0x19b   : > { %v1149_v10 = vpop.f32.mrf.mxu1  ;;  %v1103_v13 = vpop.f32.mrf.mxu0 }
 0x19c   : > { %v1283_v12 = vmax.f32 %v1246_v8, 0.0  ;;  %v1150_v16 = vadd.f32 %v1149_v10, %v1101_v11  ;;  %v1104_v24 = vadd.f32 %v1103_v13, %v2728_v40 }
 0x19e   : > { %v1321_v15 = vmul.f32 %v2739_v55, %v1283_v12  ;;  %v1284_v20 = vmax.f32 %v1150_v16, 0.0 }
 0x1a0   : > { %v1358_v18 = vadd.f32 %v1321_v15, %v1320_v14  ;;  %v1322_v27 = vmul.f32 %v2737_v52, %v1284_v20 }
 0x1a1   : > { %v1247_v19 = vpop.f32.mrf.mxu3  ;;  %v1201_v22 = vpop.f32.mrf.mxu2 }
 0x1a2   : > { %v1248_v21 = vadd.f32 %v1247_v19, %v1199_v17  ;;  %1359 = vadd.xlane.f32.xlu0 %v1358_v18  ;;  %v1202_v30 = vadd.f32 %v1201_v22, %v2731_v43 }
 0x1a3   : > { %v1152_v23 = vpop.f32.mrf.mxu1  ;;  %v1105_v26 = vpop.f32.mrf.mxu0 }
 0x1a4   : > { %v1285_v25 = vmax.f32 %v1248_v21, 0.0  ;;  %v1153_v29 = vadd.f32 %v1152_v23, %v1104_v24  ;;  %v1106_v37 = vadd.f32 %v1105_v26, %v2728_v40 }
 0x1a6   : > { %v1323_v28 = vmul.f32 %v2739_v55, %v1285_v25  ;;  %v1286_v33 = vmax.f32 %v1153_v29, 0.0 }
 0x1a8   : > { %v1361_v31 = vadd.f32 %v1323_v28, %v1322_v27  ;;  %v1324_v39 = vmul.f32 %v2737_v52, %v1286_v33 }
 0x1a9   : > { %v1250_v32 = vpop.f32.mrf.mxu3  ;;  %v1203_v35 = vpop.f32.mrf.mxu2 }
 0x1aa   : > { %v1251_v34 = vadd.f32 %v1250_v32, %v1202_v30  ;;  %1362 = vadd.xlane.f32.xlu1 %v1361_v31  ;;  %v1204_v54 = vadd.f32 %v1203_v35, %v2731_v43 }
 0x1ab   : > { %v1154_v36 = vpop.f32.mrf.mxu1  ;;  %v1108_v50 = vpop.f32.mrf.mxu0 }
 0x1ac   : > { %v1287_v38 = vmax.f32 %v1251_v34, 0.0  ;;  %v1155_v42 = vadd.f32 %v1154_v36, %v1106_v37  ;;  %v1109_v51 = vadd.f32 %v1108_v50, %v2728_v40 }
 0x1ae   : > { %v1325_v41 = vmul.f32 %v2739_v55, %v1287_v38  ;;  %v1288_v46 = vmax.f32 %v1155_v42, 0.0 }
 0x1b0   : > { %v1364_v44 = vadd.f32 %v1325_v41, %v1324_v39  ;;  %v1326_v57 = vmul.f32 %v2737_v52, %v1288_v46 }
 0x1b1   : > { %v1252_v45 = vpop.f32.mrf.mxu3  ;;  %v1206_v48 = vpop.f32.mrf.mxu2 }
 0x1b2   : > { %v1253_v47 = vadd.f32 %v1252_v45, %v1204_v54  ;;  %1365 = vadd.xlane.f32.xlu2 %v1364_v44  ;;  %v1207_v60 = vadd.f32 %v1206_v48, %v2731_v43 }
 0x1b3   : > { %v1157_v49 = vpop.f32.mrf.mxu1  ;;  %v1110_v56 = vpop.f32.mrf.mxu0 }
 0x1b4   : > { %v1289_v53 = vmax.f32 %v1253_v47, 0.0  ;;  %v1158_v59 = vadd.f32 %v1157_v49, %v1109_v51  ;;  %v1111_v3 = vadd.f32 %v1110_v56, %v2728_v40 }
 0x1b6   : > { %v1327_v58 = vmul.f32 %v2739_v55, %v1289_v53  ;;  %v1290_v63 = vmax.f32 %v1158_v59, 0.0 }
 0x1b8   : > { %v1367_v61 = vadd.f32 %v1327_v58, %v1326_v57  ;;  %v1328_v6 = vmul.f32 %v2737_v52, %v1290_v63 }
 0x1b9   : > { %v1255_v62 = vpop.f32.mrf.mxu3  ;;  %v1208_v1 = vpop.f32.mrf.mxu2 }
 0x1ba   : > { %v1256_v0 = vadd.f32 %v1255_v62, %v1207_v60  ;;  %1368 = vadd.xlane.f32.xlu0 %v1367_v61  ;;  %v1209_v9 = vadd.f32 %v1208_v1, %v2731_v43 }
 0x1bb   : > { %v1159_v2 = vpop.f32.mrf.mxu1  ;;  %v1113_v5 = vpop.f32.mrf.mxu0 }
 0x1bc   : > { %v1291_v4 = vmax.f32 %v1256_v0, 0.0  ;;  %v1160_v8 = vadd.f32 %v1159_v2, %v1111_v3  ;;  %v1114_v16 = vadd.f32 %v1113_v5, %v2728_v40  ;;  %v2801_v5 = vstv %s1388_s17 }
 0x1be   : > { %v1329_v7 = vmul.f32 %v2739_v55, %v1291_v4  ;;  %v1292_v12 = vmax.f32 %v1160_v8, 0.0 }
 0x1c0   : > { %v1370_v10 = vadd.f32 %v1329_v7, %v1328_v6  ;;  %v1330_v19 = vmul.f32 %v2737_v52, %v1292_v12 }
 0x1c1   : > { %v1257_v11 = vpop.f32.mrf.mxu3  ;;  %v1211_v14 = vpop.f32.mrf.mxu2 }
 0x1c2   : > { %v1258_v13 = vadd.f32 %v1257_v11, %v1209_v9  ;;  %1371 = vadd.xlane.f32.xlu1 %v1370_v10  ;;  %v1212_v22 = vadd.f32 %v1211_v14, %v2731_v43 }
 0x1c3   : > { %v1162_v15 = vpop.f32.mrf.mxu1  ;;  %v1115_v18 = vpop.f32.mrf.mxu0 }
 0x1c4   : > { %v1293_v17 = vmax.f32 %v1258_v13, 0.0  ;;  %v1163_v21 = vadd.f32 %v1162_v15, %v1114_v16  ;;  %v1116_v29 = vadd.f32 %v1115_v18, %v2728_v40 }
 0x1c6   : > { %v1331_v20 = vmul.f32 %v2739_v55, %v1293_v17  ;;  %v1294_v25 = vmax.f32 %v1163_v21, 0.0 }
 0x1c8   : > { %v1373_v23 = vadd.f32 %v1331_v20, %v1330_v19  ;;  %v1332_v31 = vmul.f32 %v2737_v52, %v1294_v25 }
 0x1c9   : > { %v1260_v24 = vpop.f32.mrf.mxu3  ;;  %v1213_v27 = vpop.f32.mrf.mxu2 }
 0x1ca   : > { %v1261_v26 = vadd.f32 %v1260_v24, %v1212_v22  ;;  %1374 = vadd.xlane.f32.xlu2 %v1373_v23  ;;  %v1214_v35 = vadd.f32 %v1213_v27, %v2731_v43 }
 0x1cb   : > { %v1164_v28 = vpop.f32.mrf.mxu1  ;;  %v1118_v34 = vpop.f32.mrf.mxu0 }
 0x1cc   : > { %v1295_v30 = vmax.f32 %v1261_v26, 0.0  ;;  %v1165_v33 = vadd.f32 %v1164_v28, %v1116_v29  ;;  %v1119_v42 = vadd.f32 %v1118_v34, %v2728_v40 }
 0x1ce   : > { %v1333_v32 = vmul.f32 %v2739_v55, %v1295_v30  ;;  %v1296_v38 = vmax.f32 %v1165_v33, 0.0 }
 0x1d0   : > { %v1376_v36 = vadd.f32 %v1333_v32, %v1332_v31  ;;  %v1334_v44 = vmul.f32 %v2737_v52, %v1296_v38 }
 0x1d1   : > { %v1262_v37 = vpop.f32.mrf.mxu3  ;;  %v1216_v41 = vpop.f32.mrf.mxu2 }
 0x1d2   : > { %v1263_v50 = vadd.f32 %v1262_v37, %v1214_v35  ;;  %1377 = vadd.xlane.f32.xlu0 %v1376_v36  ;;  %v1217_v47 = vadd.f32 %v1216_v41, %v2731_v43 }
 0x1d3   : > { %v1167_v39 = vpop.f32.mrf.mxu1  ;;  %v1120_v49 = vpop.f32.mrf.mxu0 }
 0x1d4   : > { %v1297_v54 = vmax.f32 %v1263_v50, 0.0  ;;  %v1168_v46 = vadd.f32 %v1167_v39, %v1119_v42  ;;  %v1121_v58 = vadd.f32 %v1120_v49, %v2728_v40 }
 0x1d6   : > { %v1335_v45 = vmul.f32 %v2739_v55, %v1297_v54  ;;  %v1298_v53 = vmax.f32 %v1168_v46, 0.0 }
 0x1d8   : > { %v1379_v48 = vadd.f32 %v1335_v45, %v1334_v44  ;;  %v1336_v61 = vmul.f32 %v2737_v52, %v1298_v53 }
 0x1d9   : > { %v1265_v51 = vpop.f32.mrf.mxu3  ;;  %v1218_v60 = vpop.f32.mrf.mxu2 }
 0x1da   : > { %v1266_v56 = vadd.f32 %v1265_v51, %v1217_v47  ;;  %1380 = vadd.xlane.f32.xlu1 %v1379_v48  ;;  %v1219_v0 = vadd.f32 %v1218_v60, %v2731_v43 }
 0x1db   : > { %v1169_v57 = vpop.f32.mrf.mxu1 }
 0x1dc   : > { %v1299_v59 = vmax.f32 %v1266_v56, 0.0  ;;  %v1170_v63 = vadd.f32 %v1169_v57, %v1121_v58 }
 0x1de   : > { %v1337_v62 = vmul.f32 %v2739_v55, %v1299_v59  ;;  %v1300_v3 = vmax.f32 %v1170_v63, 0.0 }
 0x1e0   : > { %v1382_v1 = vadd.f32 %v1337_v62, %v1336_v61  ;;  %v1338_v40 = vmul.f32 %v2737_v52, %v1300_v3 }
 0x1e1   : > { %v1267_v2 = vpop.f32.mrf.mxu3 }
 0x1e2   : > { %v1268_v4 = vadd.f32 %v1267_v2, %v1219_v0  ;;  %1383 = vadd.xlane.f32.xlu2 %v1382_v1 }
 0x1e4   : > { %v1301_v6 = vmax.f32 %v1268_v4, 0.0 }
 0x1e5   : > { %v1342_v7 = vpop.xlane.xlu0 %1341 }
 0x1e6   : > { %v1339_v8 = vmul.f32 %v2739_v55, %v1301_v6  ;;  %v1390_v9 = vadd.f32 %v2801_v5, %v1342_v7 }
 0x1e8   : > { %v2149_v10 = vmul.f32 -1.442695, %v1390_v9  ;;  %v1385_v11 = vadd.f32 %v1339_v8, %v1338_v40 }
 0x1ea   : > { %2311 = vpow2.f32 %v2149_v10  ;;  %1386 = vadd.xlane.f32.xlu0 %v1385_v11 }
 0x1ed   : > { %v1345_v43 = vpop.xlane.xlu0 %1344 }
 0x1ee   : > { %v1391_v12 = vadd.f32 %v2801_v5, %v1345_v43 }
 0x1f0   : > { %v2312_v13 = vpop.eup %2311  ;;  %v2150_v14 = vmul.f32 -1.442695, %v1391_v12 }
 0x1f1   : > { %v1454_v15 = vadd.f32 1.0, %v2312_v13 }
 0x1f2   : > { %2313 = vpow2.f32 %v2150_v14 }
 0x1f3   : > { %2315 = vrcp.f32 %v1454_v15  ;;  %v1481_v22 = vand.u32 2147483648, %v1454_v15  ;;  %v1479_v25 = vand.u32 2147483647, %v1454_v15  ;;  %vm1475_vm1 = vweird.f32 %v1454_v15 }
 0x1f5   : > { %v1348_v16 = vpop.xlane.xlu1 %1347  ;;  %v1482_v31 = vor.u32 1.1754944e-38, %v1481_v22  ;;  %vm1480_vm4 = vcmp.eq.f32.partialorder %v1479_v25, 8.507059e+37 }
 0x1f6   : > { %v1392_v52 = vadd.f32 %v2801_v5, %v1348_v16 }
 0x1f8   : > { %v2314_v55 = vpop.eup %2313  ;;  %v2151_v17 = vmul.f32 -1.442695, %v1392_v52 }
 0x1f9   : > { %v2316_v18 = vpop.eup %2315  ;;  %v1455_v19 = vadd.f32 1.0, %v2314_v55 }
 0x1fa   : > { %v1471_v20 = vmul.f32 %v2316_v18, %v1454_v15  ;;  %2317 = vpow2.f32 %v2151_v17  ;;  %vm1476_vm0 = vweird.f32 %v2316_v18 }
 0x1fb   : > { %2319 = vrcp.f32 %v1455_v19  ;;  %vm1477_vm3 = vmor %vm1475_vm1, %vm1476_vm0  ;;  %v1496_v37 = vand.u32 2147483648, %v1455_v19  ;;  %v1494_v39 = vand.u32 2147483647, %v1455_v19  ;;  %vm1490_vm6 = vweird.f32 %v1455_v19 }
 0x1fc   : > { %v1472_v21 = vsub.f32 1.0, %v1471_v20 }
 0x1fd   : > { %v1351_v23 = vpop.xlane.xlu1 %1350  ;;  %v1497_v46 = vor.u32 1.1754944e-38, %v1496_v37  ;;  %vm1495_vm8 = vcmp.eq.f32.partialorder %v1494_v39, 8.507059e+37 }
 0x1fe   : > { %v1473_v24 = vmul.f32 %v2316_v18, %v1472_v21  ;;  %v1393_v26 = vadd.f32 %v2801_v5, %v1351_v23 }
 0x200   : > { %v2318_v27 = vpop.eup %2317  ;;  %v1474_v28 = vadd.f32 %v2316_v18, %v1473_v24  ;;  %v2152_v29 = vmul.f32 -1.442695, %v1393_v26 }
 0x201   : > { %v2320_v30 = vpop.eup %2319  ;;  %v1456_v32 = vadd.f32 1.0, %v2318_v27 }
 0x202   : > { %v1478_v33 = vsel %vm1477_vm3, %v2316_v18, %v1474_v28  ;;  %v1486_v34 = vmul.f32 %v2320_v30, %v1455_v19  ;;  %2321 = vpow2.f32 %v2152_v29  ;;  %vm1491_vm5 = vweird.f32 %v2320_v30 }
 0x203   : > { %v1483_v35 = vsel %vm1480_vm4, %v1482_v31, %v1478_v33  ;;  %2323 = vrcp.f32 %v1456_v32  ;;  %vm1492_vm7 = vmor %vm1490_vm6, %vm1491_vm5  ;;  %v1511_v56 = vand.u32 2147483648, %v1456_v32  ;;  %v1509_v59 = vand.u32 2147483647, %v1456_v32 }
 0x204   : > { %1711 = vst.msk [vmem:[%s2814_s23] sm:$0xff] %vm1710_vm2, %v1483_v35  ;;  %v1487_v36 = vsub.f32 1.0, %v1486_v34  ;;  %vm1505_vm10 = vweird.f32 %v1456_v32 }
 0x205   : > { %v1354_v38 = vpop.xlane.xlu2 %1353  ;;  %v1512_v1 = vor.u32 1.1754944e-38, %v1511_v56  ;;  %vm1510_vm12 = vcmp.eq.f32.partialorder %v1509_v59, 8.507059e+37 }
 0x206   : > { %v1488_v50 = vmul.f32 %v2320_v30, %v1487_v36  ;;  %v1394_v41 = vadd.f32 %v2801_v5, %v1354_v38 }
 0x208   : > { %v2322_v42 = vpop.eup %2321  ;;  %v1489_v54 = vadd.f32 %v2320_v30, %v1488_v50  ;;  %v2153_v44 = vmul.f32 -1.442695, %v1394_v41 }
 0x209   : > { %v2324_v45 = vpop.eup %2323  ;;  %v1457_v47 = vadd.f32 1.0, %v2322_v42 }
 0x20a   : > { %v1493_v48 = vsel %vm1492_vm7, %v2320_v30, %v1489_v54  ;;  %v1501_v49 = vmul.f32 %v2324_v45, %v1456_v32  ;;  %2325 = vpow2.f32 %v2153_v44  ;;  %vm1506_vm9 = vweird.f32 %v2324_v45 }
 0x20b   : > { %v1498_v51 = vsel %vm1495_vm8, %v1497_v46, %v1493_v48  ;;  %2327 = vrcp.f32 %v1457_v47  ;;  %vm1507_vm11 = vmor %vm1505_vm10, %vm1506_vm9  ;;  %v1526_v40 = vand.u32 2147483648, %v1457_v47  ;;  %v1524_v10 = vand.u32 2147483647, %v1457_v47 }
 0x20c   : > { %1712 = vst.msk [vmem:[%s2814_s23 + $0x8] sm:$0xff] %vm1710_vm2, %v1498_v51  ;;  %v1502_v53 = vsub.f32 1.0, %v1501_v49  ;;  %vm1520_vm14 = vweird.f32 %v1457_v47 }
 0x20d   : > { %v1357_v57 = vpop.xlane.xlu2 %1356  ;;  %v1527_v15 = vor.u32 1.1754944e-38, %v1526_v40  ;;  %vm1525_vm0 = vcmp.eq.f32.partialorder %v1524_v10, 8.507059e+37 }
 0x20e   : > { %v1503_v58 = vmul.f32 %v2324_v45, %v1502_v53  ;;  %v1395_v60 = vadd.f32 %v2801_v5, %v1357_v57 }
 0x210   : > { %v2326_v61 = vpop.eup %2325  ;;  %v1504_v62 = vadd.f32 %v2324_v45, %v1503_v58  ;;  %v2154_v63 = vmul.f32 -1.442695, %v1395_v60 }
 0x211   : > { %v2328_v0 = vpop.eup %2327  ;;  %v1458_v2 = vadd.f32 1.0, %v2326_v61 }
 0x212   : > { %v1508_v3 = vsel %vm1507_vm11, %v2324_v45, %v1504_v62  ;;  %v1516_v4 = vmul.f32 %v2328_v0, %v1457_v47  ;;  %2329 = vpow2.f32 %v2154_v63  ;;  %vm1521_vm13 = vweird.f32 %v2328_v0 }
 0x213   : > { %v1513_v6 = vsel %vm1510_vm12, %v1512_v1, %v1508_v3  ;;  %2331 = vrcp.f32 %v1458_v2  ;;  %vm1522_vm15 = vmor %vm1520_vm14, %vm1521_vm13  ;;  %v1541_v19 = vand.u32 2147483648, %v1458_v2  ;;  %v1539_v22 = vand.u32 2147483647, %v1458_v2 }
 0x214   : > { %1713 = vst.msk [vmem:[%s2814_s23 + $0x10] sm:$0xff] %vm1710_vm2, %v1513_v6  ;;  %v1517_v7 = vsub.f32 1.0, %v1516_v4  ;;  %vm1535_vm3 = vweird.f32 %v1458_v2 }
 0x215   : > { %v1360_v8 = vpop.xlane.xlu0 %1359  ;;  %v1542_v28 = vor.u32 1.1754944e-38, %v1541_v19  ;;  %vm1540_vm5 = vcmp.eq.f32.partialorder %v1539_v22, 8.507059e+37 }
 0x216   : > { %v1518_v9 = vmul.f32 %v2328_v0, %v1517_v7  ;;  %v1396_v11 = vadd.f32 %v2801_v5, %v1360_v8 }
 0x218   : > { %v2330_v43 = vpop.eup %2329  ;;  %v1519_v12 = vadd.f32 %v2328_v0, %v1518_v9  ;;  %v2155_v13 = vmul.f32 -1.442695, %v1396_v11 }
 0x219   : > { %v2332_v14 = vpop.eup %2331  ;;  %v1459_v16 = vadd.f32 1.0, %v2330_v43 }
 0x21a   : > { %v1523_v52 = vsel %vm1522_vm15, %v2328_v0, %v1519_v12  ;;  %v1531_v55 = vmul.f32 %v2332_v14, %v1458_v2  ;;  %2333 = vpow2.f32 %v2155_v13  ;;  %vm1536_vm1 = vweird.f32 %v2332_v14 }
 0x21b   : > { %v1528_v17 = vsel %vm1525_vm0, %v1527_v15, %v1523_v52  ;;  %2335 = vrcp.f32 %v1459_v16  ;;  %vm1537_vm4 = vmor %vm1535_vm3, %vm1536_vm1  ;;  %v1556_v34 = vand.u32 2147483648, %v1459_v16  ;;  %v1554_v37 = vand.u32 2147483647, %v1459_v16 }
 0x21c   : > { %1714 = vst.msk [vmem:[%s2814_s23 + $0x18] sm:$0xff] %vm1710_vm2, %v1528_v17  ;;  %v1532_v18 = vsub.f32 1.0, %v1531_v55  ;;  %vm1550_vm7 = vweird.f32 %v1459_v16 }
 0x21d   : > { %v1363_v20 = vpop.xlane.xlu1 %1362  ;;  %v1557_v54 = vor.u32 1.1754944e-38, %v1556_v34  ;;  %vm1555_vm9 = vcmp.eq.f32.partialorder %v1554_v37, 8.507059e+37 }
 0x21e   : > { %v1533_v21 = vmul.f32 %v2332_v14, %v1532_v18  ;;  %v1397_v23 = vadd.f32 %v2801_v5, %v1363_v20 }
 0x220   : > { %v2334_v24 = vpop.eup %2333  ;;  %v1534_v25 = vadd.f32 %v2332_v14, %v1533_v21  ;;  %v2156_v26 = vmul.f32 -1.442695, %v1397_v23 }
 0x221   : > { %v2336_v27 = vpop.eup %2335  ;;  %v1460_v29 = vadd.f32 1.0, %v2334_v24 }
 0x222   : > { %v1538_v30 = vsel %vm1537_vm4, %v2332_v14, %v1534_v25  ;;  %v1546_v31 = vmul.f32 %v2336_v27, %v1459_v16  ;;  %2337 = vpow2.f32 %v2156_v26  ;;  %vm1551_vm6 = vweird.f32 %v2336_v27 }
 0x223   : > { %v1543_v32 = vsel %vm1540_vm5, %v1542_v28, %v1538_v30  ;;  %2339 = vrcp.f32 %v1460_v29  ;;  %vm1552_vm8 = vmor %vm1550_vm7, %vm1551_vm6  ;;  %v1571_v49 = vand.u32 2147483648, %v1460_v29  ;;  %v1569_v56 = vand.u32 2147483647, %v1460_v29 }
 0x224   : > { %1715 = vst.msk [vmem:[%s2814_s23 + $0x20] sm:$0xff] %vm1710_vm2, %v1543_v32  ;;  %v1547_v33 = vsub.f32 1.0, %v1546_v31  ;;  %vm1565_vm11 = vweird.f32 %v1460_v29 }
 0x225   : > { %v1366_v35 = vpop.xlane.xlu2 %1365  ;;  %v1572_v62 = vor.u32 1.1754944e-38, %v1571_v49  ;;  %vm1570_vm13 = vcmp.eq.f32.partialorder %v1569_v56, 8.507059e+37 }
 0x226   : > { %v1548_v36 = vmul.f32 %v2336_v27, %v1547_v33  ;;  %v1398_v38 = vadd.f32 %v2801_v5, %v1366_v35 }
 0x228   : > { %v2338_v50 = vpop.eup %2337  ;;  %v1549_v39 = vadd.f32 %v2336_v27, %v1548_v36  ;;  %v2157_v41 = vmul.f32 -1.442695, %v1398_v38 }
 0x229   : > { %v2340_v42 = vpop.eup %2339  ;;  %v1461_v44 = vadd.f32 1.0, %v2338_v50 }
 0x22a   : > { %v1553_v45 = vsel %vm1552_vm8, %v2336_v27, %v1549_v39  ;;  %v1561_v46 = vmul.f32 %v2340_v42, %v1460_v29  ;;  %2341 = vpow2.f32 %v2157_v41  ;;  %vm1566_vm10 = vweird.f32 %v2340_v42 }
 0x22b   : > { %v1558_v47 = vsel %vm1555_vm9, %v1557_v54, %v1553_v45  ;;  %2343 = vrcp.f32 %v1461_v44  ;;  %vm1567_vm12 = vmor %vm1565_vm11, %vm1566_vm10  ;;  %v1586_v4 = vand.u32 2147483648, %v1461_v44  ;;  %v1584_v40 = vand.u32 2147483647, %v1461_v44 }
 0x22c   : > { %1716 = vst.msk [vmem:[%s2814_s23 + $0x28] sm:$0xff] %vm1710_vm2, %v1558_v47  ;;  %v1562_v48 = vsub.f32 1.0, %v1561_v46  ;;  %vm1580_vm15 = vweird.f32 %v1461_v44 }
 0x22d   : > { %v1369_v51 = vpop.xlane.xlu0 %1368  ;;  %v1587_v12 = vor.u32 1.1754944e-38, %v1586_v4  ;;  %vm1585_vm1 = vcmp.eq.f32.partialorder %v1584_v40, 8.507059e+37 }
 0x22e   : > { %v1563_v53 = vmul.f32 %v2340_v42, %v1562_v48  ;;  %v1399_v57 = vadd.f32 %v2801_v5, %v1369_v51 }
 0x230   : > { %v2342_v58 = vpop.eup %2341  ;;  %v1564_v59 = vadd.f32 %v2340_v42, %v1563_v53  ;;  %v2158_v60 = vmul.f32 -1.442695, %v1399_v57 }
 0x231   : > { %v2344_v61 = vpop.eup %2343  ;;  %v1462_v63 = vadd.f32 1.0, %v2342_v58 }
 0x232   : > { %v1568_v0 = vsel %vm1567_vm12, %v2340_v42, %v1564_v59  ;;  %v1576_v1 = vmul.f32 %v2344_v61, %v1461_v44  ;;  %2345 = vpow2.f32 %v2158_v60  ;;  %vm1581_vm14 = vweird.f32 %v2344_v61 }
 0x233   : > { %v1573_v2 = vsel %vm1570_vm13, %v1572_v62, %v1568_v0  ;;  %2347 = vrcp.f32 %v1462_v63  ;;  %vm1582_vm0 = vmor %vm1580_vm15, %vm1581_vm14  ;;  %v1601_v55 = vand.u32 2147483648, %v1462_v63  ;;  %v1599_v19 = vand.u32 2147483647, %v1462_v63 }
 0x234   : > { %1717 = vst.msk [vmem:[%s2814_s23 + $0x30] sm:$0xff] %vm1710_vm2, %v1573_v2  ;;  %v1577_v3 = vsub.f32 1.0, %v1576_v1  ;;  %vm1595_vm4 = vweird.f32 %v1462_v63 }
 0x235   : > { %v1372_v6 = vpop.xlane.xlu1 %1371  ;;  %v1602_v25 = vor.u32 1.1754944e-38, %v1601_v55  ;;  %vm1600_vm6 = vcmp.eq.f32.partialorder %v1599_v19, 8.507059e+37 }
 0x236   : > { %v1578_v7 = vmul.f32 %v2344_v61, %v1577_v3  ;;  %v1400_v8 = vadd.f32 %v2801_v5, %v1372_v6 }
 0x238   : > { %v2346_v9 = vpop.eup %2345  ;;  %v1579_v10 = vadd.f32 %v2344_v61, %v1578_v7  ;;  %v2159_v11 = vmul.f32 -1.442695, %v1400_v8 }
 0x239   : > { %v2348_v43 = vpop.eup %2347  ;;  %v1463_v13 = vadd.f32 1.0, %v2346_v9 }
 0x23a   : > { %v1583_v14 = vsel %vm1582_vm0, %v2344_v61, %v1579_v10  ;;  %v1591_v15 = vmul.f32 %v2348_v43, %v1462_v63  ;;  %2349 = vpow2.f32 %v2159_v11  ;;  %vm1596_vm3 = vweird.f32 %v2348_v43 }
 0x23b   : > { %v1588_v16 = vsel %vm1585_vm1, %v1587_v12, %v1583_v14  ;;  %2351 = vrcp.f32 %v1463_v13  ;;  %vm1597_vm5 = vmor %vm1595_vm4, %vm1596_vm3  ;;  %v1616_v31 = vand.u32 2147483648, %v1463_v13  ;;  %v1614_v34 = vand.u32 2147483647, %v1463_v13 }
 0x23c   : > { %1718 = vst.msk [vmem:[%s2814_s23 + $0x38] sm:$0xff] %vm1710_vm2, %v1588_v16  ;;  %v1592_v52 = vsub.f32 1.0, %v1591_v15  ;;  %vm1610_vm8 = vweird.f32 %v1463_v13 }
 0x23d   : > { %v1375_v17 = vpop.xlane.xlu2 %1374  ;;  %v1617_v39 = vor.u32 1.1754944e-38, %v1616_v31  ;;  %vm1615_vm10 = vcmp.eq.f32.partialorder %v1614_v34, 8.507059e+37 }
 0x23e   : > { %v1593_v18 = vmul.f32 %v2348_v43, %v1592_v52  ;;  %v1401_v20 = vadd.f32 %v2801_v5, %v1375_v17 }
 0x240   : > { %v2350_v21 = vpop.eup %2349  ;;  %v1594_v22 = vadd.f32 %v2348_v43, %v1593_v18  ;;  %v2160_v23 = vmul.f32 -1.442695, %v1401_v20 }
 0x241   : > { %v2352_v24 = vpop.eup %2351  ;;  %v1464_v26 = vadd.f32 1.0, %v2350_v21 }
 0x242   : > { %v1598_v27 = vsel %vm1597_vm5, %v2348_v43, %v1594_v22  ;;  %v1606_v28 = vmul.f32 %v2352_v24, %v1463_v13  ;;  %2353 = vpow2.f32 %v2160_v23  ;;  %vm1611_vm7 = vweird.f32 %v2352_v24 }
 0x243   : > { %v1603_v29 = vsel %vm1600_vm6, %v1602_v25, %v1598_v27  ;;  %2355 = vrcp.f32 %v1464_v26  ;;  %vm1612_vm9 = vmor %vm1610_vm8, %vm1611_vm7  ;;  %v1631_v46 = vand.u32 2147483648, %v1464_v26  ;;  %v1629_v49 = vand.u32 2147483647, %v1464_v26 }
 0x244   : > { %1719 = vst.msk [vmem:[%s2814_s23 + $0x40] sm:$0xff] %vm1710_vm2, %v1603_v29  ;;  %v1607_v30 = vsub.f32 1.0, %v1606_v28  ;;  %vm1625_vm12 = vweird.f32 %v1464_v26 }
 0x245   : > { %v1378_v32 = vpop.xlane.xlu0 %1377  ;;  %v1632_v59 = vor.u32 1.1754944e-38, %v1631_v46  ;;  %vm1630_vm14 = vcmp.eq.f32.partialorder %v1629_v49, 8.507059e+37 }
 0x246   : > { %v1608_v33 = vmul.f32 %v2352_v24, %v1607_v30  ;;  %v1402_v35 = vadd.f32 %v2801_v5, %v1378_v32 }
 0x248   : > { %v2354_v36 = vpop.eup %2353  ;;  %v1609_v37 = vadd.f32 %v2352_v24, %v1608_v33  ;;  %v2161_v38 = vmul.f32 -1.442695, %v1402_v35 }
 0x249   : > { %v2356_v50 = vpop.eup %2355  ;;  %v1465_v41 = vadd.f32 1.0, %v2354_v36 }
 0x24a   : > { %v1613_v42 = vsel %vm1612_vm9, %v2352_v24, %v1609_v37  ;;  %v1621_v54 = vmul.f32 %v2356_v50, %v1464_v26  ;;  %2357 = vpow2.f32 %v2161_v38  ;;  %vm1626_vm11 = vweird.f32 %v2356_v50 }
 0x24b   : > { %v1618_v44 = vsel %vm1615_vm10, %v1617_v39, %v1613_v42  ;;  %2359 = vrcp.f32 %v1465_v41  ;;  %vm1627_vm13 = vmor %vm1625_vm12, %vm1626_vm11  ;;  %v1646_v1 = vand.u32 2147483648, %v1465_v41  ;;  %v1644_v4 = vand.u32 2147483647, %v1465_v41 }
 0x24c   : > { %1720 = vst.msk [vmem:[%s2814_s23 + $0x48] sm:$0xff] %vm1710_vm2, %v1618_v44  ;;  %v1622_v45 = vsub.f32 1.0, %v1621_v54  ;;  %vm1640_vm0 = vweird.f32 %v1465_v41 }
 0x24d   : > { %v1381_v47 = vpop.xlane.xlu1 %1380  ;;  %v1647_v10 = vor.u32 1.1754944e-38, %v1646_v1  ;;  %vm1645_vm3 = vcmp.eq.f32.partialorder %v1644_v4, 8.507059e+37 }
 0x24e   : > { %v1623_v48 = vmul.f32 %v2356_v50, %v1622_v45  ;;  %v1403_v51 = vadd.f32 %v2801_v5, %v1381_v47 }
 0x250   : > { %v2358_v53 = vpop.eup %2357  ;;  %v1624_v56 = vadd.f32 %v2356_v50, %v1623_v48  ;;  %v2162_v57 = vmul.f32 -1.442695, %v1403_v51 }
 0x251   : > { %v2360_v58 = vpop.eup %2359  ;;  %v1466_v60 = vadd.f32 1.0, %v2358_v53 }
 0x252   : > { %v1628_v61 = vsel %vm1627_vm13, %v2356_v50, %v1624_v56  ;;  %v1636_v62 = vmul.f32 %v2360_v58, %v1465_v41  ;;  %2361 = vpow2.f32 %v2162_v57  ;;  %vm1641_vm15 = vweird.f32 %v2360_v58 }
 0x253   : > { %v1633_v63 = vsel %vm1630_vm14, %v1632_v59, %v1628_v61  ;;  %2363 = vrcp.f32 %v1466_v60  ;;  %vm1642_vm1 = vmor %vm1640_vm0, %vm1641_vm15  ;;  %v1661_v15 = vand.u32 2147483648, %v1466_v60  ;;  %v1659_v55 = vand.u32 2147483647, %v1466_v60 }
 0x254   : > { %1721 = vst.msk [vmem:[%s2814_s23 + $0x50] sm:$0xff] %vm1710_vm2, %v1633_v63  ;;  %v1637_v0 = vsub.f32 1.0, %v1636_v62  ;;  %vm1655_vm5 = vweird.f32 %v1466_v60 }
 0x255   : > { %v1384_v2 = vpop.xlane.xlu2 %1383  ;;  %v1662_v22 = vor.u32 1.1754944e-38, %v1661_v15  ;;  %vm1660_vm7 = vcmp.eq.f32.partialorder %v1659_v55, 8.507059e+37 }
 0x256   : > { %v1638_v3 = vmul.f32 %v2360_v58, %v1637_v0  ;;  %v1404_v6 = vadd.f32 %v2801_v5, %v1384_v2 }
 0x258   : > { %v2362_v7 = vpop.eup %2361  ;;  %v1639_v40 = vadd.f32 %v2360_v58, %v1638_v3  ;;  %v2163_v8 = vmul.f32 -1.442695, %v1404_v6 }
 0x259   : > { %v2364_v9 = vpop.eup %2363  ;;  %v1467_v11 = vadd.f32 1.0, %v2362_v7 }
 0x25a   : > { %v1643_v43 = vsel %vm1642_vm1, %v2360_v58, %v1639_v40  ;;  %v1651_v12 = vmul.f32 %v2364_v9, %v1466_v60  ;;  %2365 = vpow2.f32 %v2163_v8  ;;  %vm1656_vm4 = vweird.f32 %v2364_v9 }
 0x25b   : > { %v1648_v13 = vsel %vm1645_vm3, %v1647_v10, %v1643_v43  ;;  %2367 = vrcp.f32 %v1467_v11  ;;  %vm1657_vm6 = vmor %vm1655_vm5, %vm1656_vm4  ;;  %v1676_v28 = vand.u32 2147483648, %v1467_v11  ;;  %v1674_v29 = vand.u32 2147483647, %v1467_v11 }
 0x25c   : > { %1722 = vst.msk [vmem:[%s2814_s23 + $0x58] sm:$0xff] %vm1710_vm2, %v1648_v13  ;;  %v1652_v14 = vsub.f32 1.0, %v1651_v12  ;;  %vm1670_vm9 = vweird.f32 %v1467_v11 }
 0x25d   : > { %v1387_v16 = vpop.xlane.xlu0 %1386  ;;  %v1677_v33 = vor.u32 1.1754944e-38, %v1676_v28  ;;  %vm1675_vm11 = vcmp.eq.f32.partialorder %v1674_v29, 8.507059e+37 }
 0x25e   : > { %v1653_v52 = vmul.f32 %v2364_v9, %v1652_v14  ;;  %v1405_v17 = vadd.f32 %v2801_v5, %v1387_v16 }
 0x260   : > { %v2366_v18 = vpop.eup %2365  ;;  %v1654_v19 = vadd.f32 %v2364_v9, %v1653_v52  ;;  %v2164_v20 = vmul.f32 -1.442695, %v1405_v17 }
 0x261   : > { %v2368_v21 = vpop.eup %2367  ;;  %v1468_v23 = vadd.f32 1.0, %v2366_v18 }
 0x262   : > { %v1658_v24 = vsel %vm1657_vm6, %v2364_v9, %v1654_v19  ;;  %v1666_v25 = vmul.f32 %v2368_v21, %v1467_v11  ;;  %2369 = vpow2.f32 %v2164_v20  ;;  %vm1671_vm8 = vweird.f32 %v2368_v21 }
 0x263   : > { %v1663_v26 = vsel %vm1660_vm7, %v1662_v22, %v1658_v24  ;;  %2371 = vrcp.f32 %v1468_v23  ;;  %vm1672_vm10 = vmor %vm1670_vm9, %vm1671_vm8  ;;  %v1691_v50 = vand.u32 2147483648, %v1468_v23  ;;  %v1689_v41 = vand.u32 2147483647, %v1468_v23 }
 0x264   : > { %1723 = vst.msk [vmem:[%s2814_s23 + $0x60] sm:$0xff] %vm1710_vm2, %v1663_v26  ;;  %v1667_v27 = vsub.f32 1.0, %v1666_v25  ;;  %vm1685_vm13 = vweird.f32 %v1468_v23 }
 0x265   : > { %v1692_v44 = vor.u32 1.1754944e-38, %v1691_v50  ;;  %vm1690_vm15 = vcmp.eq.f32.partialorder %v1689_v41, 8.507059e+37 }
 0x266   : > { %v1668_v5 = vmul.f32 %v2368_v21, %v1667_v27 }
 0x268   : > { %v2370_v30 = vpop.eup %2369  ;;  %v1669_v31 = vadd.f32 %v2368_v21, %v1668_v5 }
 0x269   : > { %v2372_v32 = vpop.eup %2371  ;;  %v1469_v34 = vadd.f32 1.0, %v2370_v30 }
 0x26a   : > { %v1673_v35 = vsel %vm1672_vm10, %v2368_v21, %v1669_v31  ;;  %v1681_v36 = vmul.f32 %v2372_v32, %v1468_v23  ;;  %vm1686_vm12 = vweird.f32 %v2372_v32 }
 0x26b   : > { %v1678_v37 = vsel %vm1675_vm11, %v1677_v33, %v1673_v35  ;;  %2373 = vrcp.f32 %v1469_v34  ;;  %vm1687_vm14 = vmor %vm1685_vm13, %vm1686_vm12  ;;  %v1706_v49 = vand.u32 2147483648, %v1469_v34  ;;  %v1704_v53 = vand.u32 2147483647, %v1469_v34 }
 0x26c   : > { %1724 = vst.msk [vmem:[%s2814_s23 + $0x68] sm:$0xff] %vm1710_vm2, %v1678_v37  ;;  %v1682_v38 = vsub.f32 1.0, %v1681_v36  ;;  %vm1700_vm1 = vweird.f32 %v1469_v34 }
 0x26d   : > { %v1707_v57 = vor.u32 1.1754944e-38, %v1706_v49  ;;  %vm1705_vm4 = vcmp.eq.f32.partialorder %v1704_v53, 8.507059e+37 }
 0x26e   : > { %v1683_v39 = vmul.f32 %v2372_v32, %v1682_v38 }
 0x270   : > { %v1684_v42 = vadd.f32 %v2372_v32, %v1683_v39 }
 0x271   : > { %v2374_v54 = vpop.eup %2373 }
 0x272   : > { %v1688_v45 = vsel %vm1687_vm14, %v2372_v32, %v1684_v42  ;;  %v1696_v46 = vmul.f32 %v2374_v54, %v1469_v34  ;;  %vm1701_vm0 = vweird.f32 %v2374_v54 }
 0x273   : > { %v1693_v47 = vsel %vm1690_vm15, %v1692_v44, %v1688_v45  ;;  %vm1702_vm3 = vmor %vm1700_vm1, %vm1701_vm0 }
 0x274   : > { %1725 = vst.msk [vmem:[%s2814_s23 + $0x70] sm:$0xff] %vm1710_vm2, %v1693_v47  ;;  %v1697_v48 = vsub.f32 1.0, %v1696_v46 }
 0x276   : > { %v1698_v51 = vmul.f32 %v2374_v54, %v1697_v48 }
 0x278   : > { %v1699_v56 = vadd.f32 %v2374_v54, %v1698_v51 }
 0x27a   : > { %v1703_v58 = vsel %vm1702_vm3, %v2374_v54, %v1699_v56 }
 0x27b   : > { %v1708_v59 = vsel %vm1705_vm4, %v1707_v57, %v1703_v58 }
 0x27c   : > { %1726 = vst.msk [vmem:[%s2814_s23 + $0x78] sm:$0xff] %vm1710_vm2, %v1708_v59 }
 0x27d PF: > { %s2885_s24 = smov %s2617_s26  ;;  %p19_p4 = scmp.ge.s32.totalorder %s2607_s22, 4  }
 0x27e   : > { %s2886_s26 = smov %s2495_s27  ;;  %s2887_s27 = smov %s2499_s28 }
 0x27f   : > { %s2888_s28 = smov %s2885_s24  ;;  %s2889_s29 = smov %s2607_s22 }
 0x280   :  { %21 = sbr.rel (!%p19_p4) target bundleno = 6 (0x6), region = 96 }
 0x285   :  { %1749 = vsyncpa [#allocation4], 1 }
 0x286   :  { %1751 = vsyncpa [#allocation4 + $0x1], 1 }
 0x287   :  { %1752 = vsyncpa [#allocation6], 1 }

</bundles_post_ra>
